<compile_context>
chip_gen: v7x
topology: tpu7x:2x2x1
jax: 0.10.0
libtpu: 0.0.40
codegen_flags: <defaults>
</compile_context>

<pallas_src>
import functools

import jax
import jax.numpy as jnp
from jax import lax
from jax.experimental import pallas as pl
from jax.experimental.pallas import tpu as pltpu


# ----------------------------------------------------------------------------
# Fused Pallas kernel (one grid step per LSTM layer; FC head fused as epilogue)
# ----------------------------------------------------------------------------
def _make_kernel(L, T, Bp, H, Din, Op):
    TB = T * Bp

    def kernel(x_ref, h0c0_ref, wih_ref, whh_ref, bias_ref, fcw_ref, fcb_ref,
               out_ref, hcn_ref, hall_sc, gates_sc):
        # x_ref    (TB, Din)  bf16   time-major flattened input (feature-padded to Din)
        # h0c0_ref (Bp, 2H)   f32    this layer's initial (h | c)
        # wih_ref  (Din, 4H)  bf16   this layer's W_ih^T, gate cols permuted [i,f,o,g]
        # whh_ref  (H, 4H)    bf16   this layer's W_hh^T
        # bias_ref (1, 4H)    f32    b_ih + b_hh (permuted)
        # fcw_ref  (H, Op)    bf16   FC weight^T, lane-padded to Op
        # fcb_ref  (1, Op)    f32
        # out_ref  (TB, Op)   f32    FC output (resident across layers, written on last)
        # hcn_ref  (Bp, 2H)   f32    this layer's final (h | c)
        # hall_sc  (TB, Din)  bf16   inter-layer activations (persists across grid steps)
        # gates_sc (TB, 4H)   f32    hoisted gate pre-activations for all timesteps
        layer = pl.program_id(0)

        # Layer 0: stage the (already zero-padded, bf16) input into the resident activation
        # scratch so every layer reads its input from VMEM the same way.
        @pl.when(layer == 0)
        def _():
            hall_sc[...] = x_ref[...]

        # Hoisted non-recurrent projection for ALL timesteps: one MXU matmul per layer,
        # parked in VMEM scratch so the time loop only keeps one step live in vregs.
        gates_sc[...] = (
            jnp.dot(hall_sc[...], wih_ref[...], preferred_element_type=jnp.float32)
            + bias_ref[...])

        whh = whh_ref[...]                                   # (H, 4H) bf16, resident
        h0 = h0c0_ref[:, :H].astype(jnp.float32)
        c0 = h0c0_ref[:, H:].astype(jnp.float32)

        def step(t, carry):
            h, c = carry
            r0 = pl.multiple_of(t * Bp, Bp)
            g = gates_sc[pl.ds(r0, Bp), :] + jnp.dot(
                h.astype(jnp.bfloat16), whh, preferred_element_type=jnp.float32)
            # Gate columns pre-permuted to [i | f | o | g]: one sigmoid group + one tanh.
            ifo = jax.nn.sigmoid(g[:, :3 * H])
            g_t = jnp.tanh(g[:, 3 * H:])
            i_g = ifo[:, 0 * H:1 * H]
            f_g = ifo[:, 1 * H:2 * H]
            o_g = ifo[:, 2 * H:3 * H]
            c_new = f_g * c + i_g * g_t
            h_new = o_g * jnp.tanh(c_new)
            hall_sc[pl.ds(r0, Bp), :H] = h_new.astype(jnp.bfloat16)
            return (h_new, c_new)

        h_fin, c_fin = lax.fori_loop(0, T, step, (h0, c0), unroll=True)

        # Final (h, c) for this layer, packed into one 2H-wide write.
        hcn_ref[...] = jnp.concatenate([h_fin, c_fin], axis=-1)

        # FC head fused as an epilogue on the last layer; lane-dense (Op multiple of 128).
        @pl.when(layer == L - 1)
        def _():
            out_ref[...] = (
                jnp.dot(hall_sc[:, :H], fcw_ref[...], preferred_element_type=jnp.float32)
                + fcb_ref[...])

    return kernel


def _fused_forward(x_tm, h0c0, wih_all, whh_all, bias_all, fcw_t, fcb,
                   *, L, T, Bp, H, Din, Op):
    TB = T * Bp
    kernel = _make_kernel(L, T, Bp, H, Din, Op)

    # VMEM budget: resident x / out / scratch + double-buffered per-layer weights & state.
    vmem_bytes = (
        TB * Din * 2                       # x (constant block, bf16)
        + TB * Op * 4                      # FC out (resident, f32)
        + TB * Din * 2                     # hall scratch (bf16)
        + TB * 4 * H * 4                   # gates scratch (f32)
        + 2 * (Din * 4 * H * 2)            # wih (double-buffered, bf16)
        + 2 * (H * 4 * H * 2)              # whh (double-buffered, bf16)
        + 2 * (4 * H * 4)                  # bias (double-buffered, f32)
        + 2 * 2 * (Bp * 2 * H * 4)         # h0c0 in + hcn out (double-buffered, f32)
        + H * Op * 2 + Op * 4)             # FC weight/bias
    vmem_limit = int(min(max(2 * vmem_bytes + (2 << 20), 8 << 20), 64 << 20))

    return pl.pallas_call(
        kernel,
        out_shape=(
            jax.ShapeDtypeStruct((TB, Op), jnp.float32),
            jax.ShapeDtypeStruct((L, Bp, 2 * H), jnp.float32),
        ),
        grid=(L,),
        in_specs=[
            pl.BlockSpec((TB, Din), lambda l: (0, 0)),             # x (time-major, bf16)
            pl.BlockSpec((None, Bp, 2 * H), lambda l: (l, 0, 0)),  # initial (h|c) per layer
            pl.BlockSpec((None, Din, 4 * H), lambda l: (l, 0, 0)), # W_ih^T per layer (bf16)
            pl.BlockSpec((None, H, 4 * H), lambda l: (l, 0, 0)),   # W_hh^T per layer (bf16)
            pl.BlockSpec((None, 1, 4 * H), lambda l: (l, 0, 0)),   # b_ih + b_hh per layer
            pl.BlockSpec((H, Op), lambda l: (0, 0)),               # FC weight^T (bf16)
            pl.BlockSpec((1, Op), lambda l: (0, 0)),               # FC bias
        ],
        out_specs=(
            pl.BlockSpec((TB, Op), lambda l: (0, 0)),              # FC out (resident)
            pl.BlockSpec((None, Bp, 2 * H), lambda l: (l, 0, 0)),  # (hn|cn) per layer
        ),
        scratch_shapes=[
            pltpu.VMEM((TB, Din), jnp.bfloat16),    # inter-layer activations
            pltpu.VMEM((TB, 4 * H), jnp.float32),   # hoisted gate pre-activations
        ],
        compiler_params=pltpu.CompilerParams(
            dimension_semantics=("arbitrary",),
            vmem_limit_bytes=vmem_limit),
    )(x_tm, h0c0, wih_all, whh_all, bias_all, fcw_t, fcb)


# ----------------------------------------------------------------------------
# One-time parameter preparation (outside the per-call jit path)
# ----------------------------------------------------------------------------
def prepare_params(params):
    """Transpose, combine biases, permute gates [i,f,g,o]->[i,f,o,g], pad, stack, cast bf16."""
    H = params["lstm"][0][1].shape[1]
    D0 = params["lstm"][0][0].shape[1]
    Din = max(D0, H)
    O = params["fc_w"].shape[0]
    Op = ((O + 127) // 128) * 128            # lane-dense FC output width

    def permute_gates(a):                    # rows grouped [i, f, g, o] along axis 0
        i, f, g, o = jnp.split(a, 4, axis=0)
        return jnp.concatenate([i, f, o, g], axis=0)

    wihs, whhs, biases = [], [], []
    for (w_ih, w_hh, b_ih, b_hh) in params["lstm"]:
        wih_t = permute_gates(w_ih).T                                   # (d_in, 4H)
        wih_t = jnp.pad(wih_t, ((0, Din - wih_t.shape[0]), (0, 0)))     # pad to common Din
        wihs.append(wih_t.astype(jnp.bfloat16))
        whhs.append(permute_gates(w_hh).T.astype(jnp.bfloat16))         # (H, 4H)
        biases.append(permute_gates(b_ih + b_hh).reshape(1, 4 * H).astype(jnp.float32))

    fc_w_t = jnp.pad(params["fc_w"].T, ((0, 0), (0, Op - O))).astype(jnp.bfloat16)  # (H, Op)
    return {
        "wih": jnp.stack(wihs, 0),                                    # (L, Din, 4H) bf16
        "whh": jnp.stack(whhs, 0),                                    # (L, H, 4H)  bf16
        "bias": jnp.stack(biases, 0),                                 # (L, 1, 4H)  f32
        "fc_w_t": fc_w_t,                                             # (H, Op)     bf16
        "fc_b": params["fc_b"].reshape(1, -1).astype(jnp.float32),    # (1, O) unpadded
    }


# ----------------------------------------------------------------------------
# Forward wrapper (PyTorch batch_first semantics)
# ----------------------------------------------------------------------------
@jax.jit
def lstm_model_forward(x, prep, hidden=None):
    """x: (B, T, D) f32. Returns (out (B,T,O), (hn (L,B,H), cn (L,B,H)))."""
    B, T, D0 = x.shape
    L, Din, fourH = prep["wih"].shape
    H = fourH // 4
    Op = prep["fc_w_t"].shape[1]
    O = prep["fc_b"].shape[1]
    Bp = max(16, ((B + 15) // 16) * 16)      # pad batch to bf16-packed sublane tile
    TB = T * Bp

    # Time-major, flattened, batch- and feature-padded, bf16.
    x_p = jnp.pad(x, ((0, Bp - B), (0, 0), (0, Din - D0)))
    x_tm = jnp.swapaxes(x_p, 0, 1).reshape(TB, Din).astype(jnp.bfloat16)

    if hidden is None:
        h0c0 = jnp.zeros((L, Bp, 2 * H), jnp.float32)
    else:
        h0, c0 = hidden
        h0 = jnp.pad(h0.astype(jnp.float32), ((0, 0), (0, Bp - B), (0, 0)))
        c0 = jnp.pad(c0.astype(jnp.float32), ((0, 0), (0, Bp - B), (0, 0)))
        h0c0 = jnp.concatenate([h0, c0], axis=-1)

    fcb_p = jnp.pad(prep["fc_b"], ((0, 0), (0, Op - O)))

    out2d, hcn = _fused_forward(
        x_tm, h0c0, prep["wih"], prep["whh"], prep["bias"], prep["fc_w_t"], fcb_p,
        L=L, T=T, Bp=Bp, H=H, Din=Din, Op=Op)

    out = jnp.swapaxes(out2d.reshape(T, Bp, Op)[:, :B, :O], 0, 1)   # (B, T, O)
    hn = hcn[:, :B, :H]
    cn = hcn[:, :B, H:]
    return out, (hn, cn)


# ----------------------------------------------------------------------------
# Pure-JAX reference (PyTorch semantics, f32, original [i,f,g,o] gate order)
# ----------------------------------------------------------------------------
def lstm_model_reference(x, params):
    B, T, _ = x.shape
    layer_in = jnp.swapaxes(x, 0, 1)                    # (T, B, D)
    hns, cns = [], []
    for (w_ih, w_hh, b_ih, b_hh) in params["lstm"]:
        H = w_hh.shape[1]

        def step(carry, x_t, w_ih=w_ih, w_hh=w_hh, b_ih=b_ih, b_hh=b_hh, H=H):
            h, c = carry
            g = x_t @ w_ih.T + b_ih + h @ w_hh.T + b_hh
            i = jax.nn.sigmoid(g[:, 0 * H:1 * H])
            f = jax.nn.sigmoid(g[:, 1 * H:2 * H])
            gg = jnp.tanh(g[:, 2 * H:3 * H])
            o = jax.nn.sigmoid(g[:, 3 * H:4 * H])
            c_new = f * c + i * gg
            h_new = o * jnp.tanh(c_new)
            return (h_new, c_new), h_new

        h0 = jnp.zeros((B, H), x.dtype)
        c0 = jnp.zeros((B, H), x.dtype)
        (hT, cT), hs = lax.scan(step, (h0, c0), layer_in)
        hns.append(hT)
        cns.append(cT)
        layer_in = hs
    out = jnp.swapaxes(layer_in, 0, 1) @ params["fc_w"].T + params["fc_b"]
    return out, (jnp.stack(hns, 0), jnp.stack(cns, 0))


# ----------------------------------------------------------------------------
# Deterministic parameter init (PyTorch-style uniform(-1/sqrt(H), 1/sqrt(H)))
# ----------------------------------------------------------------------------
def init_params(key, input_dim, hidden_dim, layer_dim, output_dim):
    k = 1.0 / jnp.sqrt(hidden_dim)
    params = {"lstm": []}
    for layer in range(layer_dim):
        d_in = input_dim if layer == 0 else hidden_dim
        key, k1, k2, k3, k4 = jax.random.split(key, 5)
        w_ih = jax.random.uniform(k1, (4 * hidden_dim, d_in), jnp.float32, -k, k)
        w_hh = jax.random.uniform(k2, (4 * hidden_dim, hidden_dim), jnp.float32, -k, k)
        b_ih = jax.random.uniform(k3, (4 * hidden_dim,), jnp.float32, -k, k)
        b_hh = jax.random.uniform(k4, (4 * hidden_dim,), jnp.float32, -k, k)
        params["lstm"].append((w_ih, w_hh, b_ih, b_hh))
    key, k5, k6 = jax.random.split(key, 3)
    params["fc_w"] = jax.random.uniform(k5, (output_dim, hidden_dim), jnp.float32, -k, k)
    params["fc_b"] = jax.random.uniform(k6, (output_dim,), jnp.float32, -k, k)
    return params


# ----------------------------------------------------------------------------
# Main
# ----------------------------------------------------------------------------
if __name__ == "__main__":
    B, T = 2, 8
    input_dim, hidden_dim, layer_dim, output_dim = 16, 32, 2, 4

    root = jax.random.PRNGKey(0)
    key_p, key_x = jax.random.split(root)
    params = init_params(key_p, input_dim, hidden_dim, layer_dim, output_dim)
    prep = prepare_params(params)                       # one-time weight prep
    x = jax.random.normal(key_x, (B, T, input_dim), dtype=jnp.float32)

    out, (hn, cn) = lstm_model_forward(x, prep)
    jax.block_until_ready((out, hn, cn))

    # Sanity check against the pure-JAX f32 reference (kernel uses bf16 MXU operands).
    out_ref, (hn_ref, cn_ref) = lstm_model_reference(x, params)
    assert out.shape == (B, T, output_dim)
    assert hn.shape == (layer_dim, B, hidden_dim)
    assert cn.shape == (layer_dim, B, hidden_dim)
    assert jnp.allclose(out, out_ref, atol=4e-2, rtol=4e-2)
    assert jnp.allclose(hn, hn_ref, atol=4e-2, rtol=4e-2)
    assert jnp.allclose(cn, cn_ref, atol=4e-2, rtol=4e-2)

    print("KERNEL_OK")
</pallas_src>

<mosaic_0001>
module attributes {stable_mosaic.version = 11 : i64} {
  func.func @kernel(%arg0: i32, %arg1: memref<128x32xbf16, #tpu.memory_space<vmem>>, %arg2: memref<1x16x64xf32, #tpu.memory_space<vmem>>, %arg3: memref<1x32x128xbf16, #tpu.memory_space<vmem>>, %arg4: memref<1x32x128xbf16, #tpu.memory_space<vmem>>, %arg5: memref<1x1x128xf32, #tpu.memory_space<vmem>>, %arg6: memref<32x128xbf16, #tpu.memory_space<vmem>>, %arg7: memref<1x128xf32, #tpu.memory_space<vmem>>, %arg8: memref<128x128xf32, #tpu.memory_space<vmem>>, %arg9: memref<1x16x64xf32, #tpu.memory_space<vmem>>, %arg10: memref<128x32xbf16, #tpu.memory_space<vmem>>, %arg11: memref<128x128xf32, #tpu.memory_space<vmem>>) attributes {dimension_semantics = [#tpu.dimension_semantics<arbitrary>], iteration_bounds = array<i64: 2>, scalar_prefetch = 0 : i64, scratch_operands = 2 : i64, tpu.core_type = #tpu.core_type<tc>, window_params = [{pipeline_mode = #tpu.pipeline_mode<synchronous>, transform_indices = @transform_0, window_bounds = array<i64: 128, 32>}, {transform_indices = @transform_1, window_bounds = array<i64: 1, 16, 64>}, {transform_indices = @transform_2, window_bounds = array<i64: 1, 32, 128>}, {transform_indices = @transform_3, window_bounds = array<i64: 1, 32, 128>}, {transform_indices = @transform_4, window_bounds = array<i64: 1, 1, 128>}, {pipeline_mode = #tpu.pipeline_mode<synchronous>, transform_indices = @transform_5, window_bounds = array<i64: 32, 128>}, {pipeline_mode = #tpu.pipeline_mode<synchronous>, transform_indices = @transform_6, window_bounds = array<i64: 1, 128>}, {pipeline_mode = #tpu.pipeline_mode<synchronous>, transform_indices = @transform_7, window_bounds = array<i64: 128, 128>}, {transform_indices = @transform_8, window_bounds = array<i64: 1, 16, 64>}]} {
    %c0_i32 = arith.constant 0 : i32
    %0 = arith.cmpi eq, %arg0, %c0_i32 : i32
    %1 = arith.extui %0 : i1 to i32
    %c0_i32_0 = arith.constant 0 : i32
    %2 = arith.cmpi ne, %1, %c0_i32_0 : i32
    scf.if %2 {
      %c0_63 = arith.constant 0 : index
      %c0_64 = arith.constant 0 : index
      %233 = vector.load %arg1[%c0_63, %c0_64] : memref<128x32xbf16, #tpu.memory_space<vmem>>, vector<128x32xbf16>
      %c0_65 = arith.constant 0 : index
      %c0_66 = arith.constant 0 : index
      %234 = vector.load %arg10[%c0_65, %c0_66] : memref<128x32xbf16, #tpu.memory_space<vmem>>, vector<128x32xbf16>
      tpu.vector_store %arg10[%c0_65, %c0_66], %233 {strides = array<i32>} : memref<128x32xbf16, #tpu.memory_space<vmem>>, vector<128x32xbf16>,
    } else {
    }
    %c0 = arith.constant 0 : index
    %c0_1 = arith.constant 0 : index
    %3 = vector.load %arg10[%c0, %c0_1] : memref<128x32xbf16, #tpu.memory_space<vmem>>, vector<128x32xbf16>
    %c0_2 = arith.constant 0 : index
    %c0_3 = arith.constant 0 : index
    %c0_4 = arith.constant 0 : index
    %4 = vector.load %arg3[%c0_2, %c0_3, %c0_4] : memref<1x32x128xbf16, #tpu.memory_space<vmem>>, vector<1x32x128xbf16>
    %5 = vector.shape_cast %4 : vector<1x32x128xbf16> to vector<32x128xbf16>
    %cst = arith.constant dense<0.000000e+00> : vector<128x128xf32>
    %6 = tpu.matmul %3, %5, %cst {dimension_numbers = #tpu.dot_dimension_numbers<[1], [0], [0], [1], [0, 0, 1, 1], [], []>} : vector<128x32xbf16>, vector<32x128xbf16>, vector<128x128xf32> -> vector<128x128xf32>
    %c0_5 = arith.constant 0 : index
    %c0_6 = arith.constant 0 : index
    %c0_7 = arith.constant 0 : index
    %7 = vector.load %arg5[%c0_5, %c0_6, %c0_7] : memref<1x1x128xf32, #tpu.memory_space<vmem>>, vector<1x1x128xf32>
    %8 = vector.shape_cast %7 : vector<1x1x128xf32> to vector<1x128xf32>
    %9 = vector.broadcast %8 : vector<1x128xf32> to vector<128x128xf32>
    %10 = arith.addf %6, %9 : vector<128x128xf32>
    %c0_8 = arith.constant 0 : index
    %c0_9 = arith.constant 0 : index
    %11 = vector.load %arg11[%c0_8, %c0_9] : memref<128x128xf32, #tpu.memory_space<vmem>>, vector<128x128xf32>
    tpu.vector_store %arg11[%c0_8, %c0_9], %10 {strides = array<i32>} : memref<128x128xf32, #tpu.memory_space<vmem>>, vector<128x128xf32>,
    %c0_10 = arith.constant 0 : index
    %c0_11 = arith.constant 0 : index
    %c0_12 = arith.constant 0 : index
    %12 = vector.load %arg4[%c0_10, %c0_11, %c0_12] : memref<1x32x128xbf16, #tpu.memory_space<vmem>>, vector<1x32x128xbf16>
    %13 = vector.shape_cast %12 : vector<1x32x128xbf16> to vector<32x128xbf16>
    %c0_13 = arith.constant 0 : index
    %c0_14 = arith.constant 0 : index
    %c0_15 = arith.constant 0 : index
    %14 = vector.load %arg2[%c0_13, %c0_14, %c0_15] : memref<1x16x64xf32, #tpu.memory_space<vmem>>, vector<1x16x32xf32>
    %15 = vector.shape_cast %14 : vector<1x16x32xf32> to vector<16x32xf32>
    %c0_16 = arith.constant 0 : index
    %c0_17 = arith.constant 0 : index
    %c32 = arith.constant 32 : index
    %16 = vector.load %arg2[%c0_16, %c0_17, %c32] : memref<1x16x64xf32, #tpu.memory_space<vmem>>, vector<1x16x32xf32>
    %17 = vector.shape_cast %16 : vector<1x16x32xf32> to vector<16x32xf32>
    %c0_i32_18 = arith.constant 0 : i32
    %c16_i32 = arith.constant 16 : i32
    %18 = arith.muli %c0_i32_18, %c16_i32 : i32
    %19 = tpu.assume_multiple %18, 16 : i32
    %20 = arith.index_cast %19 : i32 to index
    %c0_19 = arith.constant 0 : index
    %21 = vector.load %arg11[%20, %c0_19] : memref<128x128xf32, #tpu.memory_space<vmem>>, vector<16x128xf32>
    %22 = arith.truncf %15 : vector<16x32xf32> to vector<16x32xbf16>
    %cst_20 = arith.constant dense<0.000000e+00> : vector<16x128xf32>
    %23 = tpu.matmul %22, %13, %cst_20 {dimension_numbers = #tpu.dot_dimension_numbers<[1], [0], [0], [1], [0, 0, 1, 1], [], []>} : vector<16x32xbf16>, vector<32x128xbf16>, vector<16x128xf32> -> vector<16x128xf32>
    %24 = arith.addf %21, %23 : vector<16x128xf32>
    %25 = vector.extract_strided_slice %24 {offsets = [0, 0], sizes = [16, 96], strides = [1, 1]} : vector<16x128xf32> to vector<16x96xf32>
    %26 = arith.negf %25 : vector<16x96xf32>
    %27 = math.exp %26 : vector<16x96xf32>
    %cst_21 = arith.constant 1.000000e+00 : f32
    %28 = vector.broadcast %cst_21 : f32 to vector<16x96xf32>
    %29 = arith.addf %28, %27 : vector<16x96xf32>
    %30 = arith.divf %28, %29 : vector<16x96xf32>
    %31 = vector.extract_strided_slice %24 {offsets = [0, 96], sizes = [16, 32], strides = [1, 1]} : vector<16x128xf32> to vector<16x32xf32>
    %32 = math.tanh %31 : vector<16x32xf32>
    %33 = vector.extract_strided_slice %30 {offsets = [0, 0], sizes = [16, 32], strides = [1, 1]} : vector<16x96xf32> to vector<16x32xf32>
    %34 = vector.extract_strided_slice %30 {offsets = [0, 32], sizes = [16, 32], strides = [1, 1]} : vector<16x96xf32> to vector<16x32xf32>
    %35 = vector.extract_strided_slice %30 {offsets = [0, 64], sizes = [16, 32], strides = [1, 1]} : vector<16x96xf32> to vector<16x32xf32>
    %36 = arith.mulf %34, %17 : vector<16x32xf32>
    %37 = arith.mulf %33, %32 : vector<16x32xf32>
    %38 = arith.addf %36, %37 : vector<16x32xf32>
    %39 = math.tanh %38 : vector<16x32xf32>
    %40 = arith.mulf %35, %39 : vector<16x32xf32>
    %41 = arith.truncf %40 : vector<16x32xf32> to vector<16x32xbf16>
    %42 = arith.index_cast %19 : i32 to index
    %c0_22 = arith.constant 0 : index
    %43 = vector.load %arg10[%42, %c0_22] : memref<128x32xbf16, #tpu.memory_space<vmem>>, vector<16x32xbf16>
    tpu.vector_store %arg10[%42, %c0_22], %41 {strides = array<i32>} : memref<128x32xbf16, #tpu.memory_space<vmem>>, vector<16x32xbf16>,
    %c1_i32 = arith.constant 1 : i32
    %c16_i32_23 = arith.constant 16 : i32
    %44 = arith.muli %c1_i32, %c16_i32_23 : i32
    %45 = tpu.assume_multiple %44, 16 : i32
    %46 = arith.index_cast %45 : i32 to index
    %c0_24 = arith.constant 0 : index
    %47 = vector.load %arg11[%46, %c0_24] : memref<128x128xf32, #tpu.memory_space<vmem>>, vector<16x128xf32>
    %48 = arith.truncf %40 : vector<16x32xf32> to vector<16x32xbf16>
    %cst_25 = arith.constant dense<0.000000e+00> : vector<16x128xf32>
    %49 = tpu.matmul %48, %13, %cst_25 {dimension_numbers = #tpu.dot_dimension_numbers<[1], [0], [0], [1], [0, 0, 1, 1], [], []>} : vector<16x32xbf16>, vector<32x128xbf16>, vector<16x128xf32> -> vector<16x128xf32>
    %50 = arith.addf %47, %49 : vector<16x128xf32>
    %51 = vector.extract_strided_slice %50 {offsets = [0, 0], sizes = [16, 96], strides = [1, 1]} : vector<16x128xf32> to vector<16x96xf32>
    %52 = arith.negf %51 : vector<16x96xf32>
    %53 = math.exp %52 : vector<16x96xf32>
    %cst_26 = arith.constant 1.000000e+00 : f32
    %54 = vector.broadcast %cst_26 : f32 to vector<16x96xf32>
    %55 = arith.addf %54, %53 : vector<16x96xf32>
    %56 = arith.divf %54, %55 : vector<16x96xf32>
    %57 = vector.extract_strided_slice %50 {offsets = [0, 96], sizes = [16, 32], strides = [1, 1]} : vector<16x128xf32> to vector<16x32xf32>
    %58 = math.tanh %57 : vector<16x32xf32>
    %59 = vector.extract_strided_slice %56 {offsets = [0, 0], sizes = [16, 32], strides = [1, 1]} : vector<16x96xf32> to vector<16x32xf32>
    %60 = vector.extract_strided_slice %56 {offsets = [0, 32], sizes = [16, 32], strides = [1, 1]} : vector<16x96xf32> to vector<16x32xf32>
    %61 = vector.extract_strided_slice %56 {offsets = [0, 64], sizes = [16, 32], strides = [1, 1]} : vector<16x96xf32> to vector<16x32xf32>
    %62 = arith.mulf %60, %38 : vector<16x32xf32>
    %63 = arith.mulf %59, %58 : vector<16x32xf32>
    %64 = arith.addf %62, %63 : vector<16x32xf32>
    %65 = math.tanh %64 : vector<16x32xf32>
    %66 = arith.mulf %61, %65 : vector<16x32xf32>
    %67 = arith.truncf %66 : vector<16x32xf32> to vector<16x32xbf16>
    %68 = arith.index_cast %45 : i32 to index
    %c0_27 = arith.constant 0 : index
    %69 = vector.load %arg10[%68, %c0_27] : memref<128x32xbf16, #tpu.memory_space<vmem>>, vector<16x32xbf16>
    tpu.vector_store %arg10[%68, %c0_27], %67 {strides = array<i32>} : memref<128x32xbf16, #tpu.memory_space<vmem>>, vector<16x32xbf16>,
    %c2_i32 = arith.constant 2 : i32
    %c16_i32_28 = arith.constant 16 : i32
    %70 = arith.muli %c2_i32, %c16_i32_28 : i32
    %71 = tpu.assume_multiple %70, 16 : i32
    %72 = arith.index_cast %71 : i32 to index
    %c0_29 = arith.constant 0 : index
    %73 = vector.load %arg11[%72, %c0_29] : memref<128x128xf32, #tpu.memory_space<vmem>>, vector<16x128xf32>
    %74 = arith.truncf %66 : vector<16x32xf32> to vector<16x32xbf16>
    %cst_30 = arith.constant dense<0.000000e+00> : vector<16x128xf32>
    %75 = tpu.matmul %74, %13, %cst_30 {dimension_numbers = #tpu.dot_dimension_numbers<[1], [0], [0], [1], [0, 0, 1, 1], [], []>} : vector<16x32xbf16>, vector<32x128xbf16>, vector<16x128xf32> -> vector<16x128xf32>
    %76 = arith.addf %73, %75 : vector<16x128xf32>
    %77 = vector.extract_strided_slice %76 {offsets = [0, 0], sizes = [16, 96], strides = [1, 1]} : vector<16x128xf32> to vector<16x96xf32>
    %78 = arith.negf %77 : vector<16x96xf32>
    %79 = math.exp %78 : vector<16x96xf32>
    %cst_31 = arith.constant 1.000000e+00 : f32
    %80 = vector.broadcast %cst_31 : f32 to vector<16x96xf32>
    %81 = arith.addf %80, %79 : vector<16x96xf32>
    %82 = arith.divf %80, %81 : vector<16x96xf32>
    %83 = vector.extract_strided_slice %76 {offsets = [0, 96], sizes = [16, 32], strides = [1, 1]} : vector<16x128xf32> to vector<16x32xf32>
    %84 = math.tanh %83 : vector<16x32xf32>
    %85 = vector.extract_strided_slice %82 {offsets = [0, 0], sizes = [16, 32], strides = [1, 1]} : vector<16x96xf32> to vector<16x32xf32>
    %86 = vector.extract_strided_slice %82 {offsets = [0, 32], sizes = [16, 32], strides = [1, 1]} : vector<16x96xf32> to vector<16x32xf32>
    %87 = vector.extract_strided_slice %82 {offsets = [0, 64], sizes = [16, 32], strides = [1, 1]} : vector<16x96xf32> to vector<16x32xf32>
    %88 = arith.mulf %86, %64 : vector<16x32xf32>
    %89 = arith.mulf %85, %84 : vector<16x32xf32>
    %90 = arith.addf %88, %89 : vector<16x32xf32>
    %91 = math.tanh %90 : vector<16x32xf32>
    %92 = arith.mulf %87, %91 : vector<16x32xf32>
    %93 = arith.truncf %92 : vector<16x32xf32> to vector<16x32xbf16>
    %94 = arith.index_cast %71 : i32 to index
    %c0_32 = arith.constant 0 : index
    %95 = vector.load %arg10[%94, %c0_32] : memref<128x32xbf16, #tpu.memory_space<vmem>>, vector<16x32xbf16>
    tpu.vector_store %arg10[%94, %c0_32], %93 {strides = array<i32>} : memref<128x32xbf16, #tpu.memory_space<vmem>>, vector<16x32xbf16>,
    %c3_i32 = arith.constant 3 : i32
    %c16_i32_33 = arith.constant 16 : i32
    %96 = arith.muli %c3_i32, %c16_i32_33 : i32
    %97 = tpu.assume_multiple %96, 16 : i32
    %98 = arith.index_cast %97 : i32 to index
    %c0_34 = arith.constant 0 : index
    %99 = vector.load %arg11[%98, %c0_34] : memref<128x128xf32, #tpu.memory_space<vmem>>, vector<16x128xf32>
    %100 = arith.truncf %92 : vector<16x32xf32> to vector<16x32xbf16>
    %cst_35 = arith.constant dense<0.000000e+00> : vector<16x128xf32>
    %101 = tpu.matmul %100, %13, %cst_35 {dimension_numbers = #tpu.dot_dimension_numbers<[1], [0], [0], [1], [0, 0, 1, 1], [], []>} : vector<16x32xbf16>, vector<32x128xbf16>, vector<16x128xf32> -> vector<16x128xf32>
    %102 = arith.addf %99, %101 : vector<16x128xf32>
    %103 = vector.extract_strided_slice %102 {offsets = [0, 0], sizes = [16, 96], strides = [1, 1]} : vector<16x128xf32> to vector<16x96xf32>
    %104 = arith.negf %103 : vector<16x96xf32>
    %105 = math.exp %104 : vector<16x96xf32>
    %cst_36 = arith.constant 1.000000e+00 : f32
    %106 = vector.broadcast %cst_36 : f32 to vector<16x96xf32>
    %107 = arith.addf %106, %105 : vector<16x96xf32>
    %108 = arith.divf %106, %107 : vector<16x96xf32>
    %109 = vector.extract_strided_slice %102 {offsets = [0, 96], sizes = [16, 32], strides = [1, 1]} : vector<16x128xf32> to vector<16x32xf32>
    %110 = math.tanh %109 : vector<16x32xf32>
    %111 = vector.extract_strided_slice %108 {offsets = [0, 0], sizes = [16, 32], strides = [1, 1]} : vector<16x96xf32> to vector<16x32xf32>
    %112 = vector.extract_strided_slice %108 {offsets = [0, 32], sizes = [16, 32], strides = [1, 1]} : vector<16x96xf32> to vector<16x32xf32>
    %113 = vector.extract_strided_slice %108 {offsets = [0, 64], sizes = [16, 32], strides = [1, 1]} : vector<16x96xf32> to vector<16x32xf32>
    %114 = arith.mulf %112, %90 : vector<16x32xf32>
    %115 = arith.mulf %111, %110 : vector<16x32xf32>
    %116 = arith.addf %114, %115 : vector<16x32xf32>
    %117 = math.tanh %116 : vector<16x32xf32>
    %118 = arith.mulf %113, %117 : vector<16x32xf32>
    %119 = arith.truncf %118 : vector<16x32xf32> to vector<16x32xbf16>
    %120 = arith.index_cast %97 : i32 to index
    %c0_37 = arith.constant 0 : index
    %121 = vector.load %arg10[%120, %c0_37] : memref<128x32xbf16, #tpu.memory_space<vmem>>, vector<16x32xbf16>
    tpu.vector_store %arg10[%120, %c0_37], %119 {strides = array<i32>} : memref<128x32xbf16, #tpu.memory_space<vmem>>, vector<16x32xbf16>,
    %c4_i32 = arith.constant 4 : i32
    %c16_i32_38 = arith.constant 16 : i32
    %122 = arith.muli %c4_i32, %c16_i32_38 : i32
    %123 = tpu.assume_multiple %122, 16 : i32
    %124 = arith.index_cast %123 : i32 to index
    %c0_39 = arith.constant 0 : index
    %125 = vector.load %arg11[%124, %c0_39] : memref<128x128xf32, #tpu.memory_space<vmem>>, vector<16x128xf32>
    %126 = arith.truncf %118 : vector<16x32xf32> to vector<16x32xbf16>
    %cst_40 = arith.constant dense<0.000000e+00> : vector<16x128xf32>
    %127 = tpu.matmul %126, %13, %cst_40 {dimension_numbers = #tpu.dot_dimension_numbers<[1], [0], [0], [1], [0, 0, 1, 1], [], []>} : vector<16x32xbf16>, vector<32x128xbf16>, vector<16x128xf32> -> vector<16x128xf32>
    %128 = arith.addf %125, %127 : vector<16x128xf32>
    %129 = vector.extract_strided_slice %128 {offsets = [0, 0], sizes = [16, 96], strides = [1, 1]} : vector<16x128xf32> to vector<16x96xf32>
    %130 = arith.negf %129 : vector<16x96xf32>
    %131 = math.exp %130 : vector<16x96xf32>
    %cst_41 = arith.constant 1.000000e+00 : f32
    %132 = vector.broadcast %cst_41 : f32 to vector<16x96xf32>
    %133 = arith.addf %132, %131 : vector<16x96xf32>
    %134 = arith.divf %132, %133 : vector<16x96xf32>
    %135 = vector.extract_strided_slice %128 {offsets = [0, 96], sizes = [16, 32], strides = [1, 1]} : vector<16x128xf32> to vector<16x32xf32>
    %136 = math.tanh %135 : vector<16x32xf32>
    %137 = vector.extract_strided_slice %134 {offsets = [0, 0], sizes = [16, 32], strides = [1, 1]} : vector<16x96xf32> to vector<16x32xf32>
    %138 = vector.extract_strided_slice %134 {offsets = [0, 32], sizes = [16, 32], strides = [1, 1]} : vector<16x96xf32> to vector<16x32xf32>
    %139 = vector.extract_strided_slice %134 {offsets = [0, 64], sizes = [16, 32], strides = [1, 1]} : vector<16x96xf32> to vector<16x32xf32>
    %140 = arith.mulf %138, %116 : vector<16x32xf32>
    %141 = arith.mulf %137, %136 : vector<16x32xf32>
    %142 = arith.addf %140, %141 : vector<16x32xf32>
    %143 = math.tanh %142 : vector<16x32xf32>
    %144 = arith.mulf %139, %143 : vector<16x32xf32>
    %145 = arith.truncf %144 : vector<16x32xf32> to vector<16x32xbf16>
    %146 = arith.index_cast %123 : i32 to index
    %c0_42 = arith.constant 0 : index
    %147 = vector.load %arg10[%146, %c0_42] : memref<128x32xbf16, #tpu.memory_space<vmem>>, vector<16x32xbf16>
    tpu.vector_store %arg10[%146, %c0_42], %145 {strides = array<i32>} : memref<128x32xbf16, #tpu.memory_space<vmem>>, vector<16x32xbf16>,
    %c5_i32 = arith.constant 5 : i32
    %c16_i32_43 = arith.constant 16 : i32
    %148 = arith.muli %c5_i32, %c16_i32_43 : i32
    %149 = tpu.assume_multiple %148, 16 : i32
    %150 = arith.index_cast %149 : i32 to index
    %c0_44 = arith.constant 0 : index
    %151 = vector.load %arg11[%150, %c0_44] : memref<128x128xf32, #tpu.memory_space<vmem>>, vector<16x128xf32>
    %152 = arith.truncf %144 : vector<16x32xf32> to vector<16x32xbf16>
    %cst_45 = arith.constant dense<0.000000e+00> : vector<16x128xf32>
    %153 = tpu.matmul %152, %13, %cst_45 {dimension_numbers = #tpu.dot_dimension_numbers<[1], [0], [0], [1], [0, 0, 1, 1], [], []>} : vector<16x32xbf16>, vector<32x128xbf16>, vector<16x128xf32> -> vector<16x128xf32>
    %154 = arith.addf %151, %153 : vector<16x128xf32>
    %155 = vector.extract_strided_slice %154 {offsets = [0, 0], sizes = [16, 96], strides = [1, 1]} : vector<16x128xf32> to vector<16x96xf32>
    %156 = arith.negf %155 : vector<16x96xf32>
    %157 = math.exp %156 : vector<16x96xf32>
    %cst_46 = arith.constant 1.000000e+00 : f32
    %158 = vector.broadcast %cst_46 : f32 to vector<16x96xf32>
    %159 = arith.addf %158, %157 : vector<16x96xf32>
    %160 = arith.divf %158, %159 : vector<16x96xf32>
    %161 = vector.extract_strided_slice %154 {offsets = [0, 96], sizes = [16, 32], strides = [1, 1]} : vector<16x128xf32> to vector<16x32xf32>
    %162 = math.tanh %161 : vector<16x32xf32>
    %163 = vector.extract_strided_slice %160 {offsets = [0, 0], sizes = [16, 32], strides = [1, 1]} : vector<16x96xf32> to vector<16x32xf32>
    %164 = vector.extract_strided_slice %160 {offsets = [0, 32], sizes = [16, 32], strides = [1, 1]} : vector<16x96xf32> to vector<16x32xf32>
    %165 = vector.extract_strided_slice %160 {offsets = [0, 64], sizes = [16, 32], strides = [1, 1]} : vector<16x96xf32> to vector<16x32xf32>
    %166 = arith.mulf %164, %142 : vector<16x32xf32>
    %167 = arith.mulf %163, %162 : vector<16x32xf32>
    %168 = arith.addf %166, %167 : vector<16x32xf32>
    %169 = math.tanh %168 : vector<16x32xf32>
    %170 = arith.mulf %165, %169 : vector<16x32xf32>
    %171 = arith.truncf %170 : vector<16x32xf32> to vector<16x32xbf16>
    %172 = arith.index_cast %149 : i32 to index
    %c0_47 = arith.constant 0 : index
    %173 = vector.load %arg10[%172, %c0_47] : memref<128x32xbf16, #tpu.memory_space<vmem>>, vector<16x32xbf16>
    tpu.vector_store %arg10[%172, %c0_47], %171 {strides = array<i32>} : memref<128x32xbf16, #tpu.memory_space<vmem>>, vector<16x32xbf16>,
    %c6_i32 = arith.constant 6 : i32
    %c16_i32_48 = arith.constant 16 : i32
    %174 = arith.muli %c6_i32, %c16_i32_48 : i32
    %175 = tpu.assume_multiple %174, 16 : i32
    %176 = arith.index_cast %175 : i32 to index
    %c0_49 = arith.constant 0 : index
    %177 = vector.load %arg11[%176, %c0_49] : memref<128x128xf32, #tpu.memory_space<vmem>>, vector<16x128xf32>
    %178 = arith.truncf %170 : vector<16x32xf32> to vector<16x32xbf16>
    %cst_50 = arith.constant dense<0.000000e+00> : vector<16x128xf32>
    %179 = tpu.matmul %178, %13, %cst_50 {dimension_numbers = #tpu.dot_dimension_numbers<[1], [0], [0], [1], [0, 0, 1, 1], [], []>} : vector<16x32xbf16>, vector<32x128xbf16>, vector<16x128xf32> -> vector<16x128xf32>
    %180 = arith.addf %177, %179 : vector<16x128xf32>
    %181 = vector.extract_strided_slice %180 {offsets = [0, 0], sizes = [16, 96], strides = [1, 1]} : vector<16x128xf32> to vector<16x96xf32>
    %182 = arith.negf %181 : vector<16x96xf32>
    %183 = math.exp %182 : vector<16x96xf32>
    %cst_51 = arith.constant 1.000000e+00 : f32
    %184 = vector.broadcast %cst_51 : f32 to vector<16x96xf32>
    %185 = arith.addf %184, %183 : vector<16x96xf32>
    %186 = arith.divf %184, %185 : vector<16x96xf32>
    %187 = vector.extract_strided_slice %180 {offsets = [0, 96], sizes = [16, 32], strides = [1, 1]} : vector<16x128xf32> to vector<16x32xf32>
    %188 = math.tanh %187 : vector<16x32xf32>
    %189 = vector.extract_strided_slice %186 {offsets = [0, 0], sizes = [16, 32], strides = [1, 1]} : vector<16x96xf32> to vector<16x32xf32>
    %190 = vector.extract_strided_slice %186 {offsets = [0, 32], sizes = [16, 32], strides = [1, 1]} : vector<16x96xf32> to vector<16x32xf32>
    %191 = vector.extract_strided_slice %186 {offsets = [0, 64], sizes = [16, 32], strides = [1, 1]} : vector<16x96xf32> to vector<16x32xf32>
    %192 = arith.mulf %190, %168 : vector<16x32xf32>
    %193 = arith.mulf %189, %188 : vector<16x32xf32>
    %194 = arith.addf %192, %193 : vector<16x32xf32>
    %195 = math.tanh %194 : vector<16x32xf32>
    %196 = arith.mulf %191, %195 : vector<16x32xf32>
    %197 = arith.truncf %196 : vector<16x32xf32> to vector<16x32xbf16>
    %198 = arith.index_cast %175 : i32 to index
    %c0_52 = arith.constant 0 : index
    %199 = vector.load %arg10[%198, %c0_52] : memref<128x32xbf16, #tpu.memory_space<vmem>>, vector<16x32xbf16>
    tpu.vector_store %arg10[%198, %c0_52], %197 {strides = array<i32>} : memref<128x32xbf16, #tpu.memory_space<vmem>>, vector<16x32xbf16>,
    %c7_i32 = arith.constant 7 : i32
    %c16_i32_53 = arith.constant 16 : i32
    %200 = arith.muli %c7_i32, %c16_i32_53 : i32
    %201 = tpu.assume_multiple %200, 16 : i32
    %202 = arith.index_cast %201 : i32 to index
    %c0_54 = arith.constant 0 : index
    %203 = vector.load %arg11[%202, %c0_54] : memref<128x128xf32, #tpu.memory_space<vmem>>, vector<16x128xf32>
    %204 = arith.truncf %196 : vector<16x32xf32> to vector<16x32xbf16>
    %cst_55 = arith.constant dense<0.000000e+00> : vector<16x128xf32>
    %205 = tpu.matmul %204, %13, %cst_55 {dimension_numbers = #tpu.dot_dimension_numbers<[1], [0], [0], [1], [0, 0, 1, 1], [], []>} : vector<16x32xbf16>, vector<32x128xbf16>, vector<16x128xf32> -> vector<16x128xf32>
    %206 = arith.addf %203, %205 : vector<16x128xf32>
    %207 = vector.extract_strided_slice %206 {offsets = [0, 0], sizes = [16, 96], strides = [1, 1]} : vector<16x128xf32> to vector<16x96xf32>
    %208 = arith.negf %207 : vector<16x96xf32>
    %209 = math.exp %208 : vector<16x96xf32>
    %cst_56 = arith.constant 1.000000e+00 : f32
    %210 = vector.broadcast %cst_56 : f32 to vector<16x96xf32>
    %211 = arith.addf %210, %209 : vector<16x96xf32>
    %212 = arith.divf %210, %211 : vector<16x96xf32>
    %213 = vector.extract_strided_slice %206 {offsets = [0, 96], sizes = [16, 32], strides = [1, 1]} : vector<16x128xf32> to vector<16x32xf32>
    %214 = math.tanh %213 : vector<16x32xf32>
    %215 = vector.extract_strided_slice %212 {offsets = [0, 0], sizes = [16, 32], strides = [1, 1]} : vector<16x96xf32> to vector<16x32xf32>
    %216 = vector.extract_strided_slice %212 {offsets = [0, 32], sizes = [16, 32], strides = [1, 1]} : vector<16x96xf32> to vector<16x32xf32>
    %217 = vector.extract_strided_slice %212 {offsets = [0, 64], sizes = [16, 32], strides = [1, 1]} : vector<16x96xf32> to vector<16x32xf32>
    %218 = arith.mulf %216, %194 : vector<16x32xf32>
    %219 = arith.mulf %215, %214 : vector<16x32xf32>
    %220 = arith.addf %218, %219 : vector<16x32xf32>
    %221 = math.tanh %220 : vector<16x32xf32>
    %222 = arith.mulf %217, %221 : vector<16x32xf32>
    %223 = arith.truncf %222 : vector<16x32xf32> to vector<16x32xbf16>
    %224 = arith.index_cast %201 : i32 to index
    %c0_57 = arith.constant 0 : index
    %225 = vector.load %arg10[%224, %c0_57] : memref<128x32xbf16, #tpu.memory_space<vmem>>, vector<16x32xbf16>
    tpu.vector_store %arg10[%224, %c0_57], %223 {strides = array<i32>} : memref<128x32xbf16, #tpu.memory_space<vmem>>, vector<16x32xbf16>,
    %c8_i32 = arith.constant 8 : i32
    %226 = tpu.concatenate %222, %220 in 1 : vector<16x32xf32>, vector<16x32xf32> -> vector<16x64xf32>
    %c0_58 = arith.constant 0 : index
    %c0_59 = arith.constant 0 : index
    %c0_60 = arith.constant 0 : index
    %227 = vector.load %arg9[%c0_58, %c0_59, %c0_60] : memref<1x16x64xf32, #tpu.memory_space<vmem>>, vector<1x16x64xf32>
    %228 = vector.shape_cast %227 : vector<1x16x64xf32> to vector<16x64xf32>
    %229 = vector.shape_cast %226 : vector<16x64xf32> to vector<1x16x64xf32>
    tpu.vector_store %arg9[%c0_58, %c0_59, %c0_60], %229 {strides = array<i32>} : memref<1x16x64xf32, #tpu.memory_space<vmem>>, vector<1x16x64xf32>,
    %c1_i32_61 = arith.constant 1 : i32
    %230 = arith.cmpi eq, %arg0, %c1_i32_61 : i32
    %231 = arith.extui %230 : i1 to i32
    %c0_i32_62 = arith.constant 0 : i32
    %232 = arith.cmpi ne, %231, %c0_i32_62 : i32
    scf.if %232 {
      %c0_63 = arith.constant 0 : index
      %c0_64 = arith.constant 0 : index
      %233 = vector.load %arg10[%c0_63, %c0_64] : memref<128x32xbf16, #tpu.memory_space<vmem>>, vector<128x32xbf16>
      %c0_65 = arith.constant 0 : index
      %c0_66 = arith.constant 0 : index
      %234 = vector.load %arg6[%c0_65, %c0_66] : memref<32x128xbf16, #tpu.memory_space<vmem>>, vector<32x128xbf16>
      %cst_67 = arith.constant dense<0.000000e+00> : vector<128x128xf32>
      %235 = tpu.matmul %233, %234, %cst_67 {dimension_numbers = #tpu.dot_dimension_numbers<[1], [0], [0], [1], [0, 0, 1, 1], [], []>} : vector<128x32xbf16>, vector<32x128xbf16>, vector<128x128xf32> -> vector<128x128xf32>
      %c0_68 = arith.constant 0 : index
      %c0_69 = arith.constant 0 : index
      %236 = vector.load %arg7[%c0_68, %c0_69] : memref<1x128xf32, #tpu.memory_space<vmem>>, vector<1x128xf32>
      %237 = vector.broadcast %236 : vector<1x128xf32> to vector<128x128xf32>
      %238 = arith.addf %235, %237 : vector<128x128xf32>
      %c0_70 = arith.constant 0 : index
      %c0_71 = arith.constant 0 : index
      %239 = vector.load %arg8[%c0_70, %c0_71] : memref<128x128xf32, #tpu.memory_space<vmem>>, vector<128x128xf32>
      tpu.vector_store %arg8[%c0_70, %c0_71], %238 {strides = array<i32>} : memref<128x128xf32, #tpu.memory_space<vmem>>, vector<128x128xf32>,
    } else {
    }
    return
  }
  func.func @transform_0(%arg0: i32) -> (i32, i32) {
    %c0_i32 = arith.constant 0 : i32
    %c0_i32_0 = arith.constant 0 : i32
    %c0_i32_1 = arith.constant 0 : i32
    return %c0_i32, %c0_i32_0 : i32, i32
  }
  func.func @transform_1(%arg0: i32) -> (i32, i32, i32) {
    %c0_i32 = arith.constant 0 : i32
    %c0_i32_0 = arith.constant 0 : i32
    %c0_i32_1 = arith.constant 0 : i32
    return %arg0, %c0_i32, %c0_i32_0 : i32, i32, i32
  }
  func.func @transform_2(%arg0: i32) -> (i32, i32, i32) {
    %c0_i32 = arith.constant 0 : i32
    %c0_i32_0 = arith.constant 0 : i32
    %c0_i32_1 = arith.constant 0 : i32
    return %arg0, %c0_i32, %c0_i32_0 : i32, i32, i32
  }
  func.func @transform_3(%arg0: i32) -> (i32, i32, i32) {
    %c0_i32 = arith.constant 0 : i32
    %c0_i32_0 = arith.constant 0 : i32
    %c0_i32_1 = arith.constant 0 : i32
    return %arg0, %c0_i32, %c0_i32_0 : i32, i32, i32
  }
  func.func @transform_4(%arg0: i32) -> (i32, i32, i32) {
    %c0_i32 = arith.constant 0 : i32
    %c0_i32_0 = arith.constant 0 : i32
    %c0_i32_1 = arith.constant 0 : i32
    return %arg0, %c0_i32, %c0_i32_0 : i32, i32, i32
  }
  func.func @transform_5(%arg0: i32) -> (i32, i32) {
    %c0_i32 = arith.constant 0 : i32
    %c0_i32_0 = arith.constant 0 : i32
    %c0_i32_1 = arith.constant 0 : i32
    return %c0_i32, %c0_i32_0 : i32, i32
  }
  func.func @transform_6(%arg0: i32) -> (i32, i32) {
    %c0_i32 = arith.constant 0 : i32
    %c0_i32_0 = arith.constant 0 : i32
    %c0_i32_1 = arith.constant 0 : i32
    return %c0_i32, %c0_i32_0 : i32, i32
  }
  func.func @transform_7(%arg0: i32) -> (i32, i32) {
    %c0_i32 = arith.constant 0 : i32
    %c0_i32_0 = arith.constant 0 : i32
    %c0_i32_1 = arith.constant 0 : i32
    return %c0_i32, %c0_i32_0 : i32, i32
  }
  func.func @transform_8(%arg0: i32) -> (i32, i32, i32) {
    %c0_i32 = arith.constant 0 : i32
    %c0_i32_0 = arith.constant 0 : i32
    %c0_i32_1 = arith.constant 0 : i32
    return %arg0, %c0_i32, %c0_i32_0 : i32, i32, i32
  }
}

</mosaic_0001>

<bundles_post_ra>
// kernel: lstm_model_forward.1
= control target key start
LH: loop header
LB: loop body
LE: loop exit
PB: predicated region body
PF: predicated region fallthrough
CT: control target
= control target key end

     0   :  { %s2173_s27 = smov 0   ;;  %s2512_s0 = inlined_call_operand.vmem [shape: bf16[128,32], index: 0, kind: input, shape index: {}]   ;;  %s2513_s1 = inlined_call_operand.vmem [shape: f32[2,16,64], index: 1, kind: input, shape index: {}]   ;;  %s2514_s2 = inlined_call_operand.vmem [shape: bf16[2,32,128], index: 2, kind: input, shape index: {}]   ;;  %s2515_s3 = inlined_call_operand.vmem [shape: bf16[2,32,128], index: 3, kind: input, shape index: {}]   ;;  %s2516_s4 = inlined_call_operand.vmem [shape: f32[2,1,128], index: 4, kind: input, shape index: {}]   ;;  %s2517_s5 = inlined_call_operand.vmem [shape: bf16[32,128], index: 5, kind: input, shape index: {}]   ;;  %s2518_s6 = inlined_call_operand.vmem [shape: f32[1,128], index: 6, kind: input, shape index: {}]   ;;  %s2519_s7 = inlined_call_operand.vmem [shape: f32[128,128], index: 7, kind: output, shape index: {0}]   ;;  %s2520_s8 = inlined_call_operand.vmem [shape: f32[2,16,64], index: 8, kind: output, shape index: {1}]  }
   0x1 LB: > { %s2179_s28 = sadd.s32 4294967295, %s2122_s27   ;;  %p1737_p0 = scmp.ge.s32.totalorder %s2122_s27, 1  ;;  %s2122_s27 = sphi %s2173_s27, %s19_s27  }
   0x2   : > { %p288_p1 = scmp.lt.s32.totalorder %s2122_s27, 3 }
   0x4   : > { %p289_p2 = pnand %p1737_p0, %p288_p1 }
   0x5   : > { %p335_p3 = scmp.lt.s32.totalorder (!%p289_p2), %s2179_s28, 1  ;;  %p1746_p4 = scmp.ne.s32.totalorder (!%p289_p2), %s2179_s28, 0 }
   0x6   : > { %292 = sbr.rel (%p289_p2) target bundleno = 5909 (0x1715), region = 48 }
   0xd   : > { %s2185_s29 = scalar_select %p335_p3, %s2179_s28, 1 }
   0xe   : > { %362 = sbr.rel (%p1746_p4) target bundleno = 21 (0x15), region = 52  ;;  %v1974_v0 = vld [vmem:[%s2512_s0] sm:$0xff] (!%p1746_p4)   ;;  %vm427_vm0 = vcmask (!%p1746_p4), 261120   ;;  %v1975_v1 = vld [vmem:[%s2512_s0 + $0x8] sm:$0xff] (!%p1746_p4)   ;;  %v1976_v2 = vld [vmem:[%s2512_s0 + $0x10] sm:$0xff] (!%p1746_p4)  }
   0xf   : > { %s1806_s30 = sshll.u32 %s2185_s29, 4  ;;  %s352_s11 = scalar_lea.vmem %s2516_s4, %s2185_s29  ;;  %428 = vst.msk [vmem:[#allocation2] sm:$0xff] (!%p1746_p4), %vm427_vm0, %v1974_v0  ;;  %429 = vst.msk [vmem:[#allocation2 + $0x8] sm:$0xff] (!%p1746_p4), %vm427_vm0, %v1975_v1  ;;  %v1977_v3 = vld [vmem:[%s2512_s0 + $0x18] sm:$0xff] (!%p1746_p4)   ;;  %v1978_v4 = vld [vmem:[%s2512_s0 + $0x20] sm:$0xff] (!%p1746_p4)  }
  0x10   : > { %s2195_s14 = scalar_lea.vmem %s2513_s1, %s1806_s30  ;;  %s344_s17 = scalar_lea.vmem %s2514_s2, %s1806_s30  ;;  %430 = vst.msk [vmem:[#allocation2 + $0x10] sm:$0xff] (!%p1746_p4), %vm427_vm0, %v1976_v2  ;;  %431 = vst.msk [vmem:[#allocation2 + $0x18] sm:$0xff] (!%p1746_p4), %vm427_vm0, %v1977_v3  ;;  %v1979_v5 = vld [vmem:[%s2512_s0 + $0x28] sm:$0xff] (!%p1746_p4)   ;;  %v1980_v6 = vld [vmem:[%s2512_s0 + $0x30] sm:$0xff] (!%p1746_p4)  }
  0x11   : > { %s2203_s20 = scalar_lea.vmem %s2515_s3, %s1806_s30  ;;  %s2208_s23 = scalar_lea.vmem %s2520_s8, %s1806_s30  ;;  %432 = vst.msk [vmem:[#allocation2 + $0x20] sm:$0xff] (!%p1746_p4), %vm427_vm0, %v1978_v4  ;;  %433 = vst.msk [vmem:[#allocation2 + $0x28] sm:$0xff] (!%p1746_p4), %vm427_vm0, %v1979_v5  ;;  %v1981_v7 = vld [vmem:[%s2512_s0 + $0x38] sm:$0xff] (!%p1746_p4)  }
  0x12   : > { %434 = vst.msk [vmem:[#allocation2 + $0x30] sm:$0xff] (!%p1746_p4), %vm427_vm0, %v1980_v6  ;;  %435 = vst.msk [vmem:[#allocation2 + $0x38] sm:$0xff] (!%p1746_p4), %vm427_vm0, %v1981_v7 }
  0x15 PF: > { %v1982_v8 = vld [vmem:[%s344_s17] sm:$0xff]   ;;  %v2124_v9 = vmov 0.0   ;;  %vm467_vm1 = vcmask 261120   ;;  %v1984_v11 = vld [vmem:[%s344_s17 + $0x8] sm:$0xff]   ;;  %vm2125_vm2 = vmmov 0   ;;  %s2126_s29 = smov 32  }
  0x16   : > { %1874 = vmatprep.subr.bf16.mxu1 %v2124_v9  ;;  %v2237_v10 = vld [vmem:[%s2203_s20] sm:$0xff]   ;;  %1854 = vmatprep.subr.bf16.mxu0 %v1982_v8  ;;  %v2241_v12 = vld [vmem:[%s2203_s20 + $0x8] sm:$0xff]   ;;  %vm1464_vm3 = vcmask 523264   ;;  %p1792_p5 = scmp.ne.s32.totalorder %s2179_s28, 1 }
  0x17   : > { %1855 = vmatpush3.bf16.msra.mxu0 %v1982_v8  ;;  %1875 = vmatpush3.bf16.msra.mxu1 %v2237_v10  ;;  %v436_v13 = vld [vmem:[#allocation2] sm:$0xff]  ;;  %v610_v15 = vld [vmem:[%s2195_s14 + $0x8] sm:$0xff] }
  0x18   : > { %1856 = vmatprep.subr.bf16.mxu0 %v1984_v11  ;;  %1876 = vmatprep.subr.bf16.mxu1 %v2124_v9  ;;  %v609_v14 = vld [vmem:[%s2195_s14] sm:$0xff]  ;;  %v437_v17 = vld [vmem:[#allocation2 + $0x8] sm:$0xff] }
  0x19   : > { %1858 = vmatprep.mubr.msk.bf16.mxu0 %vm467_vm1, %v436_v13  ;;  %1878 = vmatprep.mubr.msk.bf16.mxu1 %vm2125_vm2, %v2124_v9  ;;  %v613_v16 = vpack.c.bf16 %v610_v15, %v609_v14  ;;  %v2269_v18 = vld [vmem:[%s352_s11] ss:$0 sm:$0xff]  ;;  %s2127_s11 = smov 64  }
  0x1b   : > { %1857 = vmatpush3.bf16.msra.mxu0 %v1984_v11  ;;  %1877 = vmatpush3.bf16.msra.mxu1 %v2241_v12 }
  0x1c   : > { %1882 = vmatprep.subr.bf16.mxu1 %v2124_v9  ;;  %1906 = vmatprep.subr.bf16.mxu0 %v2124_v9 }
  0x1e   : > { %1859 = vmatmul.mubr.msk.bf16.vlgmr.msra.gmra.mrb[0].mxu0 %vm467_vm1, %v437_v17  ;;  %1879 = vmatmul.mubr.msk.bf16.vlgmr.msra.gmra.mrb[0].mxu1 %vm467_vm1, %v613_v16 }
  0x1f   : > { %1883 = vmatpush3.bf16.msra.mxu1 %v2237_v10  ;;  %1886 = vmatprep.mubr.msk.bf16.mxu1 %vm2125_vm2, %v2124_v9 }
  0x20   : > { %1884 = vmatprep.subr.bf16.mxu1 %v2124_v9  ;;  %1907 = vmatpush3.bf16.msra.mxu0 %v2237_v10 }
  0x21   : > { %1908 = vmatprep.subr.bf16.mxu0 %v2124_v9 }
  0x23   : > { %1885 = vmatpush3.bf16.msra.mxu1 %v2241_v12 }
  0x24   : > { %1890 = vmatprep.subr.bf16.mxu1 %v2124_v9  ;;  %1909 = vmatpush3.bf16.msra.mxu0 %v2241_v12 }
  0x25   : > { %1922 = vmatprep.subr.bf16.mxu0 %v2124_v9 }
  0xf1   : > { %v2271_v19 = vpop.f32.mrb[0].mxu0  ;;  %v663_v20 = vpop.f32.mrb[0].mxu1 }
  0xf2   : > { %v526_v21 = vpop.f32.mrb[1].mxu0  ;;  %v1880_v22 = vpop.f32.mrb[1].mxu1  ;;  %v535_v59 = vadd.f32 %v2271_v19, %v2269_v18 }
  0xf3   : > { %v527_v23 = vadd.f32 %v2269_v18, %v526_v21  ;;  %v1861_v24 = vpop.f32.mrb[2].mxu0  ;;  %v666_v25 = vpop.f32.mrb[2].mxu1 }
  0xf4   : > { %v529_v26 = vpop.f32.mrb[3].mxu0  ;;  %v1881_v27 = vpop.f32.mrb[3].mxu1  ;;  %v538_v61 = vadd.f32 %v1861_v24, %v2269_v18 }
  0xf5   : > { %v670_v28 = vadd.f32 %v663_v20, %v527_v23  ;;  %v530_v29 = vadd.f32 %v2269_v18, %v529_v26  ;;  %v438_v27 = vld [vmem:[#allocation2 + $0x10] sm:$0xff] }
  0xf6   : > { %1862 = vmatprep.mubr.msk.bf16.mxu0 %vm467_vm1, %v438_v27 }
  0xf7   : > { %1986 = vtanh.f32 %v670_v28  ;;  %v671_v30 = vadd.f32 %v666_v25, %v530_v29  ;;  %v1769_v33 = vmul.f32 -1.442695, %v670_v28  ;;  %v439_v28 = vld [vmem:[#allocation2 + $0x18] sm:$0xff] }
  0xf8   : > { %1863 = vmatmul.mubr.msk.bf16.gmra.mrb[4].mxu0 %vm467_vm1, %v439_v28 }
  0xf9   : > { %1988 = vtanh.f32 %v671_v30  ;;  %v1770_v34 = vmul.f32 -1.442695, %v671_v30 }
  0xfa   : > { %1990 = vpow2.f32 %v1769_v33 }
  0xfb   : > { %1992 = vpow2.f32 %v1770_v34 }
 0x101   : > { %v1987_v31 = vpop.eup %1986 }
 0x102   : > { %690 = vrot.lane.b32.xlu0 %v1987_v31, %s2126_s29 }
 0x103   : > { %v1989_v32 = vpop.eup %1988 }
 0x104   : > { %v1991_v35 = vpop.eup %1990 }
 0x105   : > { %v678_v36 = vadd.f32 1.0, %v1991_v35  ;;  %v1993_v37 = vpop.eup %1992 }
 0x106   : > { %692 = vrot.lane.b32.xlu0 %v1989_v32, %s2126_s29  ;;  %v679_v38 = vadd.f32 1.0, %v1993_v37 }
 0x107   : > { %1994 = vrcp.f32 %v678_v36 }
 0x108   : > { %1996 = vrcp.f32 %v679_v38 }
 0x111   : > { %v1995_v39 = vpop.eup %1994 }
 0x112   : > { %v1997_v42 = vpop.eup %1996  ;;  %v686_v45 = vmul.f32 %v1995_v39, %v609_v14 }
 0x113   : > { %v687_v48 = vmul.f32 %v1997_v42, %v610_v15 }
 0x174   : > { %v691_v40 = vpop.permute.xlu0 %690 }
 0x175   : > { %v696_v41 = vmul.f32 %v1995_v39, %v691_v40 }
 0x177   : > { %700 = vrot.lane.b32.xlu1 %v696_v41, %s2126_s29 }
 0x178   : > { %v693_v43 = vpop.permute.xlu0 %692 }
 0x179   : > { %v697_v44 = vmul.f32 %v1997_v42, %v693_v43 }
 0x17b   : > { %702 = vrot.lane.b32.xlu1 %v697_v44, %s2126_s29 }
 0x1cb   : > { %v2308_v36 = vpop.f32.mrb[4].mxu0 }
 0x1cc   : > { %v542_v37 = vpop.f32.mrb[5].mxu0 }
 0x1cd   : > { %v2310_v38 = vpop.f32.mrb[6].mxu0  ;;  %v543_v41 = vadd.f32 %v2269_v18, %v542_v37 }
 0x1e9   : > { %v701_v46 = vpop.permute.xlu1 %700 }
 0x1ea   : > { %v706_v47 = vadd.f32 %v701_v46, %v686_v45 }
 0x1ec   : > { %1998 = vtanh.f32 %v706_v47 }
 0x1ed   : > { %v703_v49 = vpop.permute.xlu1 %702 }
 0x1ee   : > { %v707_v50 = vadd.f32 %v703_v49, %v687_v48 }
 0x1f0   : > { %2000 = vtanh.f32 %v707_v50 }
 0x1f6   : > { %v1999_v51 = vpop.eup %1998 }
 0x1f7   : > { %712 = vrot.lane.b32.xlu0 %v1999_v51, %s2126_s29 }
 0x1fa   : > { %v2001_v52 = vpop.eup %2000 }
 0x1fb   : > { %714 = vrot.lane.b32.xlu1 %v2001_v52, %s2126_s29 }
 0x269   : > { %v713_v53 = vpop.permute.xlu0 %712 }
 0x26a   : > { %v718_v55 = vmul.f32 %v1995_v39, %v713_v53  ;;  %v545_v39 = vpop.f32.mrb[7].mxu0 }
 0x26b   : > { %v546_v43 = vadd.f32 %v2269_v18, %v545_v39 }
 0x26d   : > { %v715_v54 = vpop.permute.xlu1 %714 }
 0x26e   : > { %v719_v56 = vmul.f32 %v1997_v42, %v715_v54 }
 0x270   : > { %v720_v57 = vpack.c.bf16 %v719_v56, %v718_v55 }
 0x272   : > { %722 = vrot.lane.b32.xlu0 %v720_v57, %s2127_s11 }
 0x2e4   : > { %v723_v58 = vpop.permute.xlu0 %722 }
 0x2e5   : > { %725 = vst.msk [vmem:[#allocation2] sm:$0xff] %vm467_vm1, %v723_v58  ;;  %1887 = vmatmul.mubr.msk.bf16.vlgmr.msra.gmra.mrb[4].mxu1 %vm467_vm1, %v723_v58 }
 0x2e6   : > { %1891 = vmatpush3.bf16.msra.mxu1 %v2237_v10  ;;  %1894 = vmatprep.mubr.msk.bf16.mxu1 %vm2125_vm2, %v2124_v9 }
 0x2e7   : > { %1892 = vmatprep.subr.bf16.mxu1 %v2124_v9 }
 0x2ea   : > { %1893 = vmatpush3.bf16.msra.mxu1 %v2241_v12 }
 0x2eb   : > { %1898 = vmatprep.subr.bf16.mxu1 %v2124_v9 }
 0x3b8   : > { %v766_v60 = vpop.f32.mrb[4].mxu1 }
 0x3b9   : > { %v773_v62 = vadd.f32 %v766_v60, %v535_v59  ;;  %v1888_v63 = vpop.f32.mrb[5].mxu1 }
 0x3ba   : > { %v769_v0 = vpop.f32.mrb[6].mxu1 }
 0x3bb   : > { %2002 = vtanh.f32 %v773_v62  ;;  %v774_v1 = vadd.f32 %v769_v0, %v538_v61  ;;  %v1889_v2 = vpop.f32.mrb[7].mxu1  ;;  %v1772_v5 = vmul.f32 -1.442695, %v773_v62 }
 0x3bd   : > { %2004 = vtanh.f32 %v774_v1  ;;  %v1773_v6 = vmul.f32 -1.442695, %v774_v1 }
 0x3be   : > { %2006 = vpow2.f32 %v1772_v5 }
 0x3bf   : > { %2008 = vpow2.f32 %v1773_v6 }
 0x3c5   : > { %v2003_v3 = vpop.eup %2002 }
 0x3c6   : > { %793 = vrot.lane.b32.xlu1 %v2003_v3, %s2126_s29 }
 0x3c7   : > { %v2005_v4 = vpop.eup %2004 }
 0x3c8   : > { %795 = vrot.lane.b32.xlu0 %v2005_v4, %s2126_s29  ;;  %v2007_v7 = vpop.eup %2006 }
 0x3c9   : > { %v2009_v8 = vpop.eup %2008  ;;  %v781_v11 = vadd.f32 1.0, %v2007_v7 }
 0x3ca   : > { %v782_v13 = vadd.f32 1.0, %v2009_v8 }
 0x3cb   : > { %2010 = vrcp.f32 %v781_v11 }
 0x3cc   : > { %2012 = vrcp.f32 %v782_v13 }
 0x3d5   : > { %v2011_v14 = vpop.eup %2010 }
 0x3d6   : > { %v2013_v17 = vpop.eup %2012  ;;  %v789_v21 = vmul.f32 %v2011_v14, %v706_v47 }
 0x3d7   : > { %v790_v24 = vmul.f32 %v2013_v17, %v707_v50 }
 0x438   : > { %v794_v15 = vpop.permute.xlu1 %793 }
 0x439   : > { %v799_v16 = vmul.f32 %v2011_v14, %v794_v15 }
 0x43a   : > { %v796_v19 = vpop.permute.xlu0 %795 }
 0x43b   : > { %803 = vrot.lane.b32.xlu1 %v799_v16, %s2126_s29  ;;  %v800_v20 = vmul.f32 %v2013_v17, %v796_v19  ;;  %v551_v16 = vadd.f32 %v2308_v36, %v2269_v18  ;;  %v554_v19 = vadd.f32 %v2310_v38, %v2269_v18 }
 0x43d   : > { %805 = vrot.lane.b32.xlu0 %v800_v20, %s2126_s29 }
 0x4ad   : > { %v804_v22 = vpop.permute.xlu1 %803 }
 0x4ae   : > { %v2297_v23 = vadd.f32 %v804_v22, %v789_v21 }
 0x4af   : > { %v806_v25 = vpop.permute.xlu0 %805 }
 0x4b0   : > { %2014 = vtanh.f32 %v2297_v23  ;;  %v2300_v26 = vadd.f32 %v806_v25, %v790_v24 }
 0x4b2   : > { %2016 = vtanh.f32 %v2300_v26 }
 0x4ba   : > { %v2015_v29 = vpop.eup %2014 }
 0x4bb   : > { %815 = vrot.lane.b32.xlu1 %v2015_v29, %s2126_s29 }
 0x4bc   : > { %v2017_v30 = vpop.eup %2016 }
 0x4bd   : > { %817 = vrot.lane.b32.xlu0 %v2017_v30, %s2126_s29 }
 0x52d   : > { %v816_v31 = vpop.permute.xlu1 %815 }
 0x52e   : > { %v821_v33 = vmul.f32 %v2011_v14, %v816_v31 }
 0x52f   : > { %v818_v32 = vpop.permute.xlu0 %817 }
 0x530   : > { %v822_v34 = vmul.f32 %v2013_v17, %v818_v32 }
 0x532   : > { %v823_v35 = vpack.c.bf16 %v822_v34, %v821_v33 }
 0x534   : > { %825 = vrot.lane.b32.xlu1 %v823_v35, %s2127_s11 }
 0x5a6   : > { %v826_v40 = vpop.permute.xlu1 %825 }
 0x5a7   : > { %829 = vst.msk [vmem:[#allocation2 + $0x8] sm:$0xff] %vm467_vm1, %v826_v40  ;;  %1895 = vmatmul.mubr.msk.bf16.vlgmr.msra.gmra.mrb[8].mxu1 %vm467_vm1, %v826_v40 }
 0x5a8   : > { %1899 = vmatpush3.bf16.msra.mxu1 %v2237_v10  ;;  %1902 = vmatprep.mubr.msk.bf16.mxu1 %vm2125_vm2, %v2124_v9 }
 0x5a9   : > { %1900 = vmatprep.subr.bf16.mxu1 %v2124_v9 }
 0x5ac   : > { %1901 = vmatpush3.bf16.msra.mxu1 %v2241_v12 }
 0x5ad   : > { %1914 = vmatprep.subr.bf16.mxu1 %v2124_v9 }
 0x67a   : > { %v870_v42 = vpop.f32.mrb[8].mxu1 }
 0x67b   : > { %v877_v44 = vadd.f32 %v870_v42, %v543_v41  ;;  %v1896_v45 = vpop.f32.mrb[9].mxu1 }
 0x67c   : > { %v873_v46 = vpop.f32.mrb[10].mxu1  ;;  %v440_v45 = vld [vmem:[#allocation2 + $0x20] sm:$0xff] }
 0x67d   : > { %2018 = vtanh.f32 %v877_v44  ;;  %v878_v47 = vadd.f32 %v873_v46, %v546_v43  ;;  %v1897_v48 = vpop.f32.mrb[11].mxu1  ;;  %v1775_v51 = vmul.f32 -1.442695, %v877_v44  ;;  %v441_v46 = vld [vmem:[#allocation2 + $0x28] sm:$0xff]  ;;  %1866 = vmatprep.mubr.msk.bf16.mxu0 %vm467_vm1, %v440_v45 }
 0x67e   : > { %1867 = vmatmul.mubr.msk.bf16.gmra.mrb[8].mxu0 %vm467_vm1, %v441_v46 }
 0x67f   : > { %2020 = vtanh.f32 %v878_v47  ;;  %v1776_v52 = vmul.f32 -1.442695, %v878_v47  ;;  %v442_v47 = vld [vmem:[#allocation2 + $0x30] sm:$0xff] }
 0x680   : > { %2022 = vpow2.f32 %v1775_v51  ;;  %1870 = vmatprep.mubr.msk.bf16.mxu0 %vm467_vm1, %v442_v47 }
 0x681   : > { %2024 = vpow2.f32 %v1776_v52 }
 0x687   : > { %v2019_v49 = vpop.eup %2018 }
 0x688   : > { %897 = vrot.lane.b32.xlu0 %v2019_v49, %s2126_s29  ;;  %v443_v49 = vld [vmem:[#allocation2 + $0x38] sm:$0xff] }
 0x689   : > { %v2021_v50 = vpop.eup %2020  ;;  %1871 = vmatmul.mubr.msk.bf16.gmra.mrb[12].mxu0 %vm467_vm1, %v443_v49 }
 0x68a   : > { %899 = vrot.lane.b32.xlu1 %v2021_v50, %s2126_s29  ;;  %v2023_v53 = vpop.eup %2022  ;;  %1910 = vmatprep.mubr.msk.bf16.mxu0 %vm2125_vm2, %v2124_v9 }
 0x68b   : > { %v2025_v54 = vpop.eup %2024  ;;  %v885_v55 = vadd.f32 1.0, %v2023_v53 }
 0x68c   : > { %v886_v56 = vadd.f32 1.0, %v2025_v54 }
 0x68d   : > { %2026 = vrcp.f32 %v885_v55 }
 0x68e   : > { %2028 = vrcp.f32 %v886_v56 }
 0x697   : > { %v2027_v57 = vpop.eup %2026 }
 0x698   : > { %v2029_v60 = vpop.eup %2028  ;;  %v893_v63 = vmul.f32 %v2027_v57, %v2297_v23 }
 0x699   : > { %v894_v2 = vmul.f32 %v2029_v60, %v2300_v26 }
 0x6fa   : > { %v898_v58 = vpop.permute.xlu0 %897 }
 0x6fb   : > { %v903_v59 = vmul.f32 %v2027_v57, %v898_v58 }
 0x6fc   : > { %v900_v61 = vpop.permute.xlu1 %899 }
 0x6fd   : > { %907 = vrot.lane.b32.xlu0 %v903_v59, %s2126_s29  ;;  %v904_v62 = vmul.f32 %v2029_v60, %v900_v61 }
 0x6ff   : > { %909 = vrot.lane.b32.xlu1 %v904_v62, %s2126_s29 }
 0x751   : > { %v2362_v56 = vpop.f32.mrb[8].mxu0 }
 0x76f   : > { %v908_v0 = vpop.permute.xlu0 %907 }
 0x770   : > { %v913_v1 = vadd.f32 %v908_v0, %v893_v63 }
 0x771   : > { %v910_v3 = vpop.permute.xlu1 %909 }
 0x772   : > { %2030 = vtanh.f32 %v913_v1  ;;  %v914_v4 = vadd.f32 %v910_v3, %v894_v2 }
 0x774   : > { %2032 = vtanh.f32 %v914_v4 }
 0x77c   : > { %v2031_v5 = vpop.eup %2030 }
 0x77d   : > { %919 = vrot.lane.b32.xlu0 %v2031_v5, %s2126_s29 }
 0x77e   : > { %v2033_v6 = vpop.eup %2032 }
 0x77f   : > { %921 = vrot.lane.b32.xlu1 %v2033_v6, %s2126_s29 }
 0x7ef   : > { %v920_v7 = vpop.permute.xlu0 %919 }
 0x7f0   : > { %v925_v11 = vmul.f32 %v2027_v57, %v920_v7  ;;  %v558_v57 = vpop.f32.mrb[9].mxu0 }
 0x7f1   : > { %v922_v8 = vpop.permute.xlu1 %921  ;;  %v2364_v58 = vpop.f32.mrb[10].mxu0 }
 0x7f2   : > { %v926_v13 = vmul.f32 %v2029_v60, %v922_v8  ;;  %v561_v59 = vpop.f32.mrb[11].mxu0 }
 0x7f3   : > { %v2366_v60 = vpop.f32.mrb[12].mxu0  ;;  %v562_v3 = vadd.f32 %v2269_v18, %v561_v59 }
 0x7f4   : > { %v927_v14 = vpack.c.bf16 %v926_v13, %v925_v11  ;;  %v2368_v61 = vpop.f32.mrb[13].mxu0 }
 0x7f5   : > { %v2370_v62 = vpop.f32.mrb[14].mxu0 }
 0x7f6   : > { %929 = vrot.lane.b32.xlu0 %v927_v14, %s2127_s11  ;;  %v2372_v63 = vpop.f32.mrb[15].mxu0 }
 0x868   : > { %v930_v15 = vpop.permute.xlu0 %929 }
 0x869   : > { %933 = vst.msk [vmem:[#allocation2 + $0x10] sm:$0xff] %vm467_vm1, %v930_v15  ;;  %1903 = vmatmul.mubr.msk.bf16.vlgmr.msra.gmra.mrb[12].mxu1 %vm467_vm1, %v930_v15 }
 0x86a   : > { %1915 = vmatpush3.bf16.msra.mxu1 %v2237_v10  ;;  %1918 = vmatprep.mubr.msk.bf16.mxu1 %vm2125_vm2, %v2124_v9 }
 0x86b   : > { %1916 = vmatprep.subr.bf16.mxu1 %v2124_v9 }
 0x86e   : > { %1917 = vmatpush3.bf16.msra.mxu1 %v2241_v12 }
 0x86f   : > { %1930 = vmatprep.subr.bf16.mxu1 %v2124_v9 }
 0x93c   : > { %v974_v17 = vpop.f32.mrb[12].mxu1 }
 0x93d   : > { %v981_v20 = vadd.f32 %v974_v17, %v551_v16  ;;  %v1904_v21 = vpop.f32.mrb[13].mxu1 }
 0x93e   : > { %v977_v22 = vpop.f32.mrb[14].mxu1 }
 0x93f   : > { %2034 = vtanh.f32 %v981_v20  ;;  %v982_v23 = vadd.f32 %v977_v22, %v554_v19  ;;  %v1905_v24 = vpop.f32.mrb[15].mxu1  ;;  %v1778_v27 = vmul.f32 -1.442695, %v981_v20 }
 0x941   : > { %2036 = vtanh.f32 %v982_v23  ;;  %v1779_v28 = vmul.f32 -1.442695, %v982_v23 }
 0x942   : > { %2038 = vpow2.f32 %v1778_v27 }
 0x943   : > { %2040 = vpow2.f32 %v1779_v28 }
 0x949   : > { %v2035_v25 = vpop.eup %2034 }
 0x94a   : > { %1001 = vrot.lane.b32.xlu1 %v2035_v25, %s2126_s29 }
 0x94b   : > { %v2037_v26 = vpop.eup %2036 }
 0x94c   : > { %1003 = vrot.lane.b32.xlu0 %v2037_v26, %s2126_s29  ;;  %v2039_v29 = vpop.eup %2038 }
 0x94d   : > { %v2041_v30 = vpop.eup %2040  ;;  %v989_v31 = vadd.f32 1.0, %v2039_v29 }
 0x94e   : > { %v990_v32 = vadd.f32 1.0, %v2041_v30 }
 0x94f   : > { %2042 = vrcp.f32 %v989_v31 }
 0x950   : > { %2044 = vrcp.f32 %v990_v32 }
 0x959   : > { %v2043_v33 = vpop.eup %2042 }
 0x95a   : > { %v2045_v36 = vpop.eup %2044  ;;  %v997_v39 = vmul.f32 %v2043_v33, %v913_v1  ;;  %v559_v1 = vadd.f32 %v2269_v18, %v558_v57 }
 0x95b   : > { %v998_v42 = vmul.f32 %v2045_v36, %v914_v4 }
 0x9bc   : > { %v1002_v34 = vpop.permute.xlu1 %1001 }
 0x9bd   : > { %v1007_v35 = vmul.f32 %v2043_v33, %v1002_v34 }
 0x9be   : > { %v1004_v37 = vpop.permute.xlu0 %1003 }
 0x9bf   : > { %1011 = vrot.lane.b32.xlu1 %v1007_v35, %s2126_s29  ;;  %v1008_v38 = vmul.f32 %v2045_v36, %v1004_v37 }
 0x9c1   : > { %1013 = vrot.lane.b32.xlu0 %v1008_v38, %s2126_s29 }
 0xa31   : > { %v1012_v40 = vpop.permute.xlu1 %1011 }
 0xa32   : > { %v2347_v41 = vadd.f32 %v1012_v40, %v997_v39 }
 0xa33   : > { %v1014_v43 = vpop.permute.xlu0 %1013 }
 0xa34   : > { %2046 = vtanh.f32 %v2347_v41  ;;  %v2350_v44 = vadd.f32 %v1014_v43, %v998_v42  ;;  %v570_v43 = vadd.f32 %v2364_v58, %v2269_v18 }
 0xa36   : > { %2048 = vtanh.f32 %v2350_v44 }
 0xa3e   : > { %v2047_v48 = vpop.eup %2046 }
 0xa3f   : > { %1023 = vrot.lane.b32.xlu1 %v2047_v48, %s2126_s29 }
 0xa40   : > { %v2049_v50 = vpop.eup %2048 }
 0xa41   : > { %1025 = vrot.lane.b32.xlu0 %v2049_v50, %s2126_s29 }
 0xab1   : > { %v1024_v51 = vpop.permute.xlu1 %1023 }
 0xab2   : > { %v1029_v53 = vmul.f32 %v2043_v33, %v1024_v51 }
 0xab3   : > { %v1026_v52 = vpop.permute.xlu0 %1025 }
 0xab4   : > { %v1030_v54 = vmul.f32 %v2045_v36, %v1026_v52 }
 0xab6   : > { %v1031_v55 = vpack.c.bf16 %v1030_v54, %v1029_v53 }
 0xab8   : > { %1033 = vrot.lane.b32.xlu1 %v1031_v55, %s2127_s11 }
 0xb2a   : > { %v1034_v0 = vpop.permute.xlu1 %1033 }
 0xb2b   : > { %1037 = vst.msk [vmem:[#allocation2 + $0x18] sm:$0xff] %vm467_vm1, %v1034_v0  ;;  %1911 = vmatmul.mubr.msk.bf16.vlgmr.msra.gmra.mrb[16].mxu0 %vm467_vm1, %v1034_v0 }
 0xb2c   : > { %1923 = vmatpush3.bf16.msra.mxu0 %v2237_v10  ;;  %1926 = vmatprep.mubr.msk.bf16.mxu0 %vm2125_vm2, %v2124_v9 }
 0xb2d   : > { %1924 = vmatprep.subr.bf16.mxu0 %v2124_v9 }
 0xb30   : > { %1925 = vmatpush3.bf16.msra.mxu0 %v2241_v12 }
 0xbfe   : > { %v1078_v2 = vpop.f32.mrb[16].mxu0 }
 0xbff   : > { %v1085_v4 = vadd.f32 %v1078_v2, %v559_v1  ;;  %v1912_v5 = vpop.f32.mrb[17].mxu0 }
 0xc00   : > { %v1081_v6 = vpop.f32.mrb[18].mxu0 }
 0xc01   : > { %2050 = vtanh.f32 %v1085_v4  ;;  %v1086_v7 = vadd.f32 %v1081_v6, %v562_v3  ;;  %v1913_v8 = vpop.f32.mrb[19].mxu0  ;;  %v1781_v14 = vmul.f32 -1.442695, %v1085_v4 }
 0xc03   : > { %2052 = vtanh.f32 %v1086_v7  ;;  %v1782_v15 = vmul.f32 -1.442695, %v1086_v7 }
 0xc04   : > { %2054 = vpow2.f32 %v1781_v14 }
 0xc05   : > { %2056 = vpow2.f32 %v1782_v15 }
 0xc0b   : > { %v2051_v11 = vpop.eup %2050 }
 0xc0c   : > { %1105 = vrot.lane.b32.xlu0 %v2051_v11, %s2126_s29 }
 0xc0d   : > { %v2053_v13 = vpop.eup %2052 }
 0xc0e   : > { %1107 = vrot.lane.b32.xlu1 %v2053_v13, %s2126_s29  ;;  %v2055_v16 = vpop.eup %2054 }
 0xc0f   : > { %v2057_v17 = vpop.eup %2056  ;;  %v1093_v19 = vadd.f32 1.0, %v2055_v16 }
 0xc10   : > { %v1094_v20 = vadd.f32 1.0, %v2057_v17  ;;  %v575_v17 = vadd.f32 %v2269_v18, %v2368_v61 }
 0xc11   : > { %2058 = vrcp.f32 %v1093_v19 }
 0xc12   : > { %2060 = vrcp.f32 %v1094_v20  ;;  %v578_v20 = vadd.f32 %v2269_v18, %v2372_v63 }
 0xc1b   : > { %v2059_v21 = vpop.eup %2058 }
 0xc1c   : > { %v2061_v24 = vpop.eup %2060  ;;  %v1101_v27 = vmul.f32 %v2059_v21, %v2347_v41  ;;  %v567_v41 = vadd.f32 %v2362_v56, %v2269_v18 }
 0xc1d   : > { %v1102_v30 = vmul.f32 %v2061_v24, %v2350_v44 }
 0xc7e   : > { %v1106_v22 = vpop.permute.xlu0 %1105 }
 0xc7f   : > { %v1111_v23 = vmul.f32 %v2059_v21, %v1106_v22 }
 0xc80   : > { %v1108_v25 = vpop.permute.xlu1 %1107 }
 0xc81   : > { %1115 = vrot.lane.b32.xlu0 %v1111_v23, %s2126_s29  ;;  %v1112_v26 = vmul.f32 %v2061_v24, %v1108_v25 }
 0xc83   : > { %1117 = vrot.lane.b32.xlu1 %v1112_v26, %s2126_s29 }
 0xcf3   : > { %v1116_v28 = vpop.permute.xlu0 %1115 }
 0xcf4   : > { %v1121_v29 = vadd.f32 %v1116_v28, %v1101_v27 }
 0xcf5   : > { %v1118_v31 = vpop.permute.xlu1 %1117 }
 0xcf6   : > { %2062 = vtanh.f32 %v1121_v29  ;;  %v1122_v32 = vadd.f32 %v1118_v31, %v1102_v30 }
 0xcf8   : > { %2064 = vtanh.f32 %v1122_v32 }
 0xd00   : > { %v2063_v33 = vpop.eup %2062 }
 0xd01   : > { %1127 = vrot.lane.b32.xlu0 %v2063_v33, %s2126_s29 }
 0xd02   : > { %v2065_v34 = vpop.eup %2064 }
 0xd03   : > { %1129 = vrot.lane.b32.xlu1 %v2065_v34, %s2126_s29 }
 0xd73   : > { %v1128_v35 = vpop.permute.xlu0 %1127 }
 0xd74   : > { %v1133_v37 = vmul.f32 %v2059_v21, %v1128_v35 }
 0xd75   : > { %v1130_v36 = vpop.permute.xlu1 %1129 }
 0xd76   : > { %v1134_v38 = vmul.f32 %v2061_v24, %v1130_v36 }
 0xd78   : > { %v1135_v39 = vpack.c.bf16 %v1134_v38, %v1133_v37 }
 0xd7a   : > { %1137 = vrot.lane.b32.xlu0 %v1135_v39, %s2127_s11 }
 0xdec   : > { %v1138_v40 = vpop.permute.xlu0 %1137 }
 0xded   : > { %1141 = vst.msk [vmem:[#allocation2 + $0x20] sm:$0xff] %vm467_vm1, %v1138_v40  ;;  %1919 = vmatmul.mubr.msk.bf16.vlgmr.msra.gmra.mrb[16].mxu1 %vm467_vm1, %v1138_v40 }
 0xdee   : > { %1931 = vmatpush3.bf16.msra.mxu1 %v2237_v10  ;;  %1934 = vmatprep.mubr.msk.bf16.mxu1 %vm2125_vm2, %v2124_v9 }
 0xdef   : > { %1932 = vmatprep.subr.bf16.mxu1 %v2124_v9 }
 0xdf2   : > { %1933 = vmatpush3.bf16.msra.mxu1 %v2241_v12 }
 0xec0   : > { %v1182_v42 = vpop.f32.mrb[16].mxu1 }
 0xec1   : > { %v1189_v44 = vadd.f32 %v1182_v42, %v567_v41  ;;  %v1920_v45 = vpop.f32.mrb[17].mxu1 }
 0xec2   : > { %v1185_v46 = vpop.f32.mrb[18].mxu1 }
 0xec3   : > { %2066 = vtanh.f32 %v1189_v44  ;;  %v1190_v47 = vadd.f32 %v1185_v46, %v570_v43  ;;  %v1921_v10 = vpop.f32.mrb[19].mxu1  ;;  %v1784_v12 = vmul.f32 -1.442695, %v1189_v44 }
 0xec5   : > { %2068 = vtanh.f32 %v1190_v47  ;;  %v1785_v49 = vmul.f32 -1.442695, %v1190_v47 }
 0xec6   : > { %2070 = vpow2.f32 %v1784_v12 }
 0xec7   : > { %2072 = vpow2.f32 %v1785_v49  ;;  %v583_v49 = vadd.f32 %v2366_v60, %v2269_v18 }
 0xecd   : > { %v2067_v48 = vpop.eup %2066 }
 0xece   : > { %1209 = vrot.lane.b32.xlu1 %v2067_v48, %s2126_s29 }
 0xecf   : > { %v2069_v9 = vpop.eup %2068 }
 0xed0   : > { %1211 = vrot.lane.b32.xlu0 %v2069_v9, %s2126_s29  ;;  %v2071_v50 = vpop.eup %2070 }
 0xed1   : > { %v2073_v51 = vpop.eup %2072  ;;  %v1197_v52 = vadd.f32 1.0, %v2071_v50 }
 0xed2   : > { %v1198_v53 = vadd.f32 1.0, %v2073_v51  ;;  %v586_v51 = vadd.f32 %v2370_v62, %v2269_v18 }
 0xed3   : > { %2074 = vrcp.f32 %v1197_v52 }
 0xed4   : > { %2076 = vrcp.f32 %v1198_v53 }
 0xedd   : > { %v2075_v54 = vpop.eup %2074 }
 0xede   : > { %v2077_v57 = vpop.eup %2076  ;;  %v1205_v0 = vmul.f32 %v2075_v54, %v1121_v29 }
 0xedf   : > { %v1206_v3 = vmul.f32 %v2077_v57, %v1122_v32 }
 0xf40   : > { %v1210_v55 = vpop.permute.xlu1 %1209 }
 0xf41   : > { %v1215_v56 = vmul.f32 %v2075_v54, %v1210_v55 }
 0xf42   : > { %v1212_v58 = vpop.permute.xlu0 %1211 }
 0xf43   : > { %1219 = vrot.lane.b32.xlu1 %v1215_v56, %s2126_s29  ;;  %v1216_v59 = vmul.f32 %v2077_v57, %v1212_v58 }
 0xf45   : > { %1221 = vrot.lane.b32.xlu0 %v1216_v59, %s2126_s29 }
 0xfb5   : > { %v1220_v1 = vpop.permute.xlu1 %1219 }
 0xfb6   : > { %v1225_v2 = vadd.f32 %v1220_v1, %v1205_v0 }
 0xfb7   : > { %v1222_v4 = vpop.permute.xlu0 %1221 }
 0xfb8   : > { %2078 = vtanh.f32 %v1225_v2  ;;  %v1226_v5 = vadd.f32 %v1222_v4, %v1206_v3 }
 0xfba   : > { %2080 = vtanh.f32 %v1226_v5 }
 0xfc2   : > { %v2079_v6 = vpop.eup %2078 }
 0xfc3   : > { %1231 = vrot.lane.b32.xlu1 %v2079_v6, %s2126_s29 }
 0xfc4   : > { %v2081_v7 = vpop.eup %2080 }
 0xfc5   : > { %1233 = vrot.lane.b32.xlu0 %v2081_v7, %s2126_s29 }
0x1035   : > { %v1232_v8 = vpop.permute.xlu1 %1231 }
0x1036   : > { %v1237_v13 = vmul.f32 %v2075_v54, %v1232_v8 }
0x1037   : > { %v1234_v11 = vpop.permute.xlu0 %1233 }
0x1038   : > { %v1238_v14 = vmul.f32 %v2077_v57, %v1234_v11 }
0x103a   : > { %v1239_v15 = vpack.c.bf16 %v1238_v14, %v1237_v13 }
0x103c   : > { %1241 = vrot.lane.b32.xlu1 %v1239_v15, %s2127_s11 }
0x10ae   : > { %v1242_v16 = vpop.permute.xlu1 %1241 }
0x10af   : > { %1245 = vst.msk [vmem:[#allocation2 + $0x28] sm:$0xff] %vm467_vm1, %v1242_v16  ;;  %1927 = vmatmul.mubr.msk.bf16.vlgmr.msra.gmra.mrb[20].mxu0 %vm467_vm1, %v1242_v16 }
0x1182   : > { %v1286_v19 = vpop.f32.mrb[20].mxu0 }
0x1183   : > { %v1293_v21 = vadd.f32 %v1286_v19, %v575_v17  ;;  %v1928_v22 = vpop.f32.mrb[21].mxu0 }
0x1184   : > { %v1289_v23 = vpop.f32.mrb[22].mxu0 }
0x1185   : > { %2082 = vtanh.f32 %v1293_v21  ;;  %v1294_v24 = vadd.f32 %v1289_v23, %v578_v20  ;;  %v1929_v25 = vpop.f32.mrb[23].mxu0  ;;  %v1787_v28 = vmul.f32 -1.442695, %v1293_v21 }
0x1187   : > { %2084 = vtanh.f32 %v1294_v24  ;;  %v1788_v29 = vmul.f32 -1.442695, %v1294_v24 }
0x1188   : > { %2086 = vpow2.f32 %v1787_v28 }
0x1189   : > { %2088 = vpow2.f32 %v1788_v29 }
0x118f   : > { %v2083_v26 = vpop.eup %2082 }
0x1190   : > { %1313 = vrot.lane.b32.xlu0 %v2083_v26, %s2126_s29 }
0x1191   : > { %v2085_v27 = vpop.eup %2084 }
0x1192   : > { %1315 = vrot.lane.b32.xlu1 %v2085_v27, %s2126_s29  ;;  %v2087_v61 = vpop.eup %2086 }
0x1193   : > { %v2089_v30 = vpop.eup %2088  ;;  %v1301_v63 = vadd.f32 1.0, %v2087_v61  ;;  %v2114_v61 = vld [vmem:[%s2517_s5] sm:$0xff] (!%p1792_p5)  }
0x1194   : > { %v1302_v31 = vadd.f32 1.0, %v2089_v30  ;;  %v2115_v30 = vld [vmem:[%s2517_s5 + $0x8] sm:$0xff] (!%p1792_p5)   ;;  %1938 = vmatprep.subr.bf16.mxu0 (!%p1792_p5), %v2114_v61  ;;  %1958 = vmatprep.subr.bf16.mxu1 (!%p1792_p5), %v2114_v61 }
0x1195   : > { %2090 = vrcp.f32 %v1301_v63  ;;  %v1471_v63 = vld [vmem:[#allocation2] sm:$0xff] (!%p1792_p5)  ;;  %1939 = vmatpush3.bf16.msra.mxu0 (!%p1792_p5), %v2114_v61 }
0x1196   : > { %2092 = vrcp.f32 %v1302_v31  ;;  %v1475_v31 = vld [vmem:[#allocation2 + $0x20] sm:$0xff] (!%p1792_p5)  ;;  %1940 = vmatprep.subr.bf16.mxu0 (!%p1792_p5), %v2115_v30  ;;  %1942 = vmatprep.mubr.msk.bf16.mxu0 (!%p1792_p5), %vm467_vm1, %v1471_v63 }
0x1199   : > { %1941 = vmatpush3.bf16.msra.mxu0 (!%p1792_p5), %v2115_v30 }
0x119f   : > { %v2091_v32 = vpop.eup %2090 }
0x11a0   : > { %v2093_v35 = vpop.eup %2092  ;;  %v1309_v38 = vmul.f32 %v2091_v32, %v1225_v2 }
0x11a1   : > { %v1310_v41 = vmul.f32 %v2093_v35, %v1226_v5 }
0x1202   : > { %v1314_v33 = vpop.permute.xlu0 %1313 }
0x1203   : > { %v1319_v34 = vmul.f32 %v2091_v32, %v1314_v33  ;;  %v1476_v33 = vld [vmem:[#allocation2 + $0x28] sm:$0xff] (!%p1792_p5) }
0x1204   : > { %v1316_v36 = vpop.permute.xlu1 %1315 }
0x1205   : > { %1323 = vrot.lane.b32.xlu0 %v1319_v34, %s2126_s29  ;;  %v1320_v37 = vmul.f32 %v2093_v35, %v1316_v36  ;;  %v1473_v34 = vld [vmem:[#allocation2 + $0x10] sm:$0xff] (!%p1792_p5)  ;;  %v1474_v36 = vld [vmem:[#allocation2 + $0x18] sm:$0xff] (!%p1792_p5) }
0x1207   : > { %1325 = vrot.lane.b32.xlu1 %v1320_v37, %s2126_s29 }
0x1277   : > { %v1324_v39 = vpop.permute.xlu0 %1323 }
0x1278   : > { %v1329_v40 = vadd.f32 %v1324_v39, %v1309_v38  ;;  %v1793_v38 = vld [vmem:[%s2518_s6] ss:$0 sm:$0xff] (!%p1792_p5) }
0x1279   : > { %v1326_v42 = vpop.permute.xlu1 %1325 }
0x127a   : > { %2094 = vtanh.f32 %v1329_v40  ;;  %v1330_v43 = vadd.f32 %v1326_v42, %v1310_v41 }
0x127c   : > { %2096 = vtanh.f32 %v1330_v43 }
0x1284   : > { %v2095_v44 = vpop.eup %2094 }
0x1285   : > { %1335 = vrot.lane.b32.xlu0 %v2095_v44, %s2126_s29 }
0x1286   : > { %v2097_v45 = vpop.eup %2096 }
0x1287   : > { %1337 = vrot.lane.b32.xlu1 %v2097_v45, %s2126_s29 }
0x12f7   : > { %v1336_v46 = vpop.permute.xlu0 %1335 }
0x12f8   : > { %v1341_v10 = vmul.f32 %v2091_v32, %v1336_v46  ;;  %v1472_v32 = vld [vmem:[#allocation2 + $0x8] sm:$0xff] (!%p1792_p5) }
0x12f9   : > { %v1338_v47 = vpop.permute.xlu1 %1337  ;;  %1943 = vmatmul.mubr.msk.bf16.vlgmr.msra.gmra.mrb[0].mxu0 (!%p1792_p5), %vm467_vm1, %v1472_v32 }
0x12fa   : > { %v1342_v48 = vmul.f32 %v2093_v35, %v1338_v47  ;;  %1946 = vmatprep.mubr.msk.bf16.mxu0 (!%p1792_p5), %vm467_vm1, %v1473_v34 }
0x12fc   : > { %v1343_v9 = vpack.c.bf16 %v1342_v48, %v1341_v10 }
0x12fe   : > { %1345 = vrot.lane.b32.xlu0 %v1343_v9, %s2127_s11 }
0x1301   : > { %1947 = vmatmul.mubr.msk.bf16.gmra.mrb[4].mxu0 (!%p1792_p5), %vm467_vm1, %v1474_v36 }
0x1370   : > { %v1346_v12 = vpop.permute.xlu0 %1345 }
0x1371   : > { %1349 = vst.msk [vmem:[#allocation2 + $0x30] sm:$0xff] %vm467_vm1, %v1346_v12  ;;  %1935 = vmatmul.mubr.msk.bf16.vlgmr.msra.gmra.mrb[20].mxu1 %vm467_vm1, %v1346_v12 }
0x1372   : > { %1960 = vmatpush3.bf16.msra.mxu1 (!%p1792_p5), %v2114_v61  ;;  %1950 = vmatprep.mubr.msk.bf16.mxu1 (!%p1792_p5), %vm467_vm1, %v1475_v31 }
0x1373   : > { %1959 = vmatprep.subr.bf16.mxu1 (!%p1792_p5), %v2115_v30 }
0x1376   : > { %1961 = vmatpush3.bf16.msra.mxu1 (!%p1792_p5), %v2115_v30 }
0x1378   : > { %v1477_v35 = vld [vmem:[#allocation2 + $0x30] sm:$0xff] (!%p1792_p5) }
0x1379   : > { %1951 = vmatmul.mubr.msk.bf16.vlgmr.msra.gmra.mrb[0].mxu1 (!%p1792_p5), %vm467_vm1, %v1476_v33 }
0x137a   : > { %1954 = vmatprep.mubr.msk.bf16.mxu1 (!%p1792_p5), %vm467_vm1, %v1477_v35 }
0x13cc   : > { %v1944_v39 = vpop.f32.mrb[0].mxu0 (!%p1792_p5) }
0x13cd   : > { %v1569_v41 = vadd.f32 (!%p1792_p5), %v1944_v39, %v1793_v38 }
0x13cf   : > { %1625 = vst [vmem:[%s2519_s7 + $0x10] sm:$0xff] (!%p1792_p5), %v1569_v41 }
0x1444   : > { %v1390_v50 = vpop.f32.mrb[20].mxu1 }
0x1445   : > { %v1397_v52 = vadd.f32 %v1390_v50, %v583_v49  ;;  %v1936_v53 = vpop.f32.mrb[21].mxu1 }
0x1446   : > { %v1393_v54 = vpop.f32.mrb[22].mxu1 }
0x1447   : > { %2098 = vtanh.f32 %v1397_v52  ;;  %v1398_v55 = vadd.f32 %v1393_v54, %v586_v51  ;;  %v1937_v56 = vpop.f32.mrb[23].mxu1  ;;  %v1790_v59 = vmul.f32 -1.442695, %v1397_v52 }
0x1449   : > { %2100 = vtanh.f32 %v1398_v55  ;;  %v1791_v0 = vmul.f32 -1.442695, %v1398_v55 }
0x144a   : > { %2102 = vpow2.f32 %v1790_v59 }
0x144b   : > { %2104 = vpow2.f32 %v1791_v0 }
0x1451   : > { %v2099_v57 = vpop.eup %2098 }
0x1452   : > { %1417 = vrot.lane.b32.xlu1 %v2099_v57, %s2126_s29 }
0x1453   : > { %v2101_v58 = vpop.eup %2100 }
0x1454   : > { %1419 = vrot.lane.b32.xlu0 %v2101_v58, %s2126_s29  ;;  %v2103_v60 = vpop.eup %2102 }
0x1455   : > { %v2105_v1 = vpop.eup %2104  ;;  %v1405_v18 = vadd.f32 1.0, %v2103_v60 }
0x1456   : > { %v1406_v62 = vadd.f32 1.0, %v2105_v1 }
0x1457   : > { %2106 = vrcp.f32 %v1405_v18 }
0x1458   : > { %2108 = vrcp.f32 %v1406_v62 }
0x1461   : > { %v2107_v2 = vpop.eup %2106 }
0x1462   : > { %v2109_v5 = vpop.eup %2108  ;;  %v1413_v8 = vmul.f32 %v2107_v2, %v1329_v40  ;;  %v1952_v40 = vpop.f32.mrb[0].mxu1 (!%p1792_p5) }
0x1463   : > { %v1414_v14 = vmul.f32 %v2109_v5, %v1330_v43  ;;  %v1601_v42 = vadd.f32 (!%p1792_p5), %v1952_v40, %v1793_v38  ;;  %v1560_v43 = vpop.f32.mrb[1].mxu0 (!%p1792_p5)  ;;  %v1592_v44 = vpop.f32.mrb[1].mxu1 (!%p1792_p5) }
0x1464   : > { %v1561_v45 = vadd.f32 (!%p1792_p5), %v1793_v38, %v1560_v43  ;;  %v1593_v46 = vadd.f32 (!%p1792_p5), %v1793_v38, %v1592_v44  ;;  %v1945_v47 = vpop.f32.mrb[2].mxu0 (!%p1792_p5)  ;;  %v1953_v10 = vpop.f32.mrb[2].mxu1 (!%p1792_p5) }
0x1465   : > { %1633 = vst [vmem:[%s2519_s7 + $0x50] sm:$0xff] (!%p1792_p5), %v1601_v42  ;;  %v1572_v48 = vadd.f32 (!%p1792_p5), %v1945_v47, %v1793_v38  ;;  %v1604_v9 = vadd.f32 (!%p1792_p5), %v1953_v10, %v1793_v38  ;;  %v1563_v12 = vpop.f32.mrb[3].mxu0 (!%p1792_p5)  ;;  %v1595_v49 = vpop.f32.mrb[3].mxu1 (!%p1792_p5) }
0x1466   : > { %1623 = vst [vmem:[%s2519_s7] sm:$0xff] (!%p1792_p5), %v1561_v45  ;;  %1631 = vst [vmem:[%s2519_s7 + $0x40] sm:$0xff] (!%p1792_p5), %v1593_v46  ;;  %v1564_v50 = vadd.f32 (!%p1792_p5), %v1793_v38, %v1563_v12  ;;  %v1596_v51 = vadd.f32 (!%p1792_p5), %v1793_v38, %v1595_v49  ;;  %v1948_v52 = vpop.f32.mrb[4].mxu0 (!%p1792_p5) }
0x1467   : > { %1626 = vst [vmem:[%s2519_s7 + $0x18] sm:$0xff] (!%p1792_p5), %v1572_v48  ;;  %1634 = vst [vmem:[%s2519_s7 + $0x58] sm:$0xff] (!%p1792_p5), %v1604_v9  ;;  %v1585_v54 = vadd.f32 (!%p1792_p5), %v1948_v52, %v1793_v38  ;;  %v1576_v56 = vpop.f32.mrb[5].mxu0 (!%p1792_p5) }
0x1468   : > { %1624 = vst [vmem:[%s2519_s7 + $0x8] sm:$0xff] (!%p1792_p5), %v1564_v50  ;;  %1632 = vst [vmem:[%s2519_s7 + $0x48] sm:$0xff] (!%p1792_p5), %v1596_v51  ;;  %v1577_v58 = vadd.f32 (!%p1792_p5), %v1793_v38, %v1576_v56  ;;  %v1949_v0 = vpop.f32.mrb[6].mxu0 (!%p1792_p5) }
0x1469   : > { %1629 = vst [vmem:[%s2519_s7 + $0x30] sm:$0xff] (!%p1792_p5), %v1585_v54  ;;  %v1588_v1 = vadd.f32 (!%p1792_p5), %v1949_v0, %v1793_v38  ;;  %v1579_v62 = vpop.f32.mrb[7].mxu0 (!%p1792_p5) }
0x146a   : > { %1627 = vst [vmem:[%s2519_s7 + $0x20] sm:$0xff] (!%p1792_p5), %v1577_v58 }
0x146b   : > { %1630 = vst [vmem:[%s2519_s7 + $0x38] sm:$0xff] (!%p1792_p5), %v1588_v1 }
0x14c4   : > { %v1418_v3 = vpop.permute.xlu1 %1417 }
0x14c5   : > { %v1423_v4 = vmul.f32 %v2107_v2, %v1418_v3  ;;  %v1580_v3 = vadd.f32 (!%p1792_p5), %v1793_v38, %v1579_v62 }
0x14c6   : > { %v1420_v6 = vpop.permute.xlu0 %1419 }
0x14c7   : > { %1427 = vrot.lane.b32.xlu1 %v1423_v4, %s2126_s29  ;;  %v1424_v7 = vmul.f32 %v2109_v5, %v1420_v6  ;;  %1628 = vst [vmem:[%s2519_s7 + $0x28] sm:$0xff] (!%p1792_p5), %v1580_v3 }
0x14c9   : > { %1429 = vrot.lane.b32.xlu0 %v1424_v7, %s2126_s29 }
0x1539   : > { %v1428_v11 = vpop.permute.xlu1 %1427 }
0x153a   : > { %v1433_v13 = vadd.f32 %v1428_v11, %v1413_v8 }
0x153b   : > { %v1430_v15 = vpop.permute.xlu0 %1429 }
0x153c   : > { %2110 = vtanh.f32 %v1433_v13  ;;  %v1434_v16 = vadd.f32 %v1430_v15, %v1414_v14 }
0x153e   : > { %2112 = vtanh.f32 %v1434_v16 }
0x1546   : > { %v2111_v17 = vpop.eup %2110 }
0x1547   : > { %1439 = vrot.lane.b32.xlu1 %v2111_v17, %s2126_s29 }
0x1548   : > { %v2113_v19 = vpop.eup %2112 }
0x1549   : > { %1441 = vrot.lane.b32.xlu0 %v2113_v19, %s2126_s29 }
0x15b9   : > { %v1440_v20 = vpop.permute.xlu1 %1439 }
0x15ba   : > { %v1445_v21 = vmul.f32 %v2107_v2, %v1440_v20 }
0x15bb   : > { %v1442_v22 = vpop.permute.xlu0 %1441 }
0x15bc   : > { %1456 = vrot.lane.b32.xlu1 %v1445_v21, %s2127_s11  ;;  %v1446_v23 = vmul.f32 %v2109_v5, %v1442_v22 }
0x15be   : > { %v1447_v24 = vpack.c.bf16 %v1446_v23, %v1445_v21  ;;  %1458 = vrot.lane.b32.xlu0 %v1446_v23, %s2127_s11 }
0x15c0   : > { %1449 = vrot.lane.b32.xlu1 %v1447_v24, %s2127_s11 }
0x162d   : > { %1470 = sbr.rel (%p1792_p5) target bundleno = 5909 (0x1715), region = 56 }
0x162e   : > { %v1457_v25 = vpop.permute.xlu1 %1456 }
0x162f   : > { %v1462_v26 = vsel %vm467_vm1, %v1457_v25, %v1433_v13 }
0x1630   : > { %1465 = vst.msk [vmem:[%s2208_s23] sm:$0xff] %vm1464_vm3, %v1462_v26  ;;  %v1459_v27 = vpop.permute.xlu0 %1458 }
0x1631   : > { %v1463_v28 = vsel %vm467_vm1, %v1459_v27, %v1434_v16 }
0x1632   : > { %1466 = vst.msk [vmem:[%s2208_s23 + $0x8] sm:$0xff] %vm1464_vm3, %v1463_v28  ;;  %v1450_v29 = vpop.permute.xlu1 %1449 }
0x1633   : > { %1453 = vst.msk [vmem:[#allocation2 + $0x38] sm:$0xff] %vm467_vm1, %v1450_v29 }
0x163a   : > { %v1478_v37 = vld [vmem:[#allocation2 + $0x38] sm:$0xff] }
0x163b   : > { %1955 = vmatmul.mubr.msk.bf16.gmra.mrb[4].mxu1 %vm467_vm1, %v1478_v37 }
0x170e   : > { %v1956_v53 = vpop.f32.mrb[4].mxu1 }
0x170f   : > { %v1617_v55 = vadd.f32 %v1956_v53, %v1793_v38  ;;  %v1608_v57 = vpop.f32.mrb[5].mxu1 }
0x1710   : > { %v1609_v59 = vadd.f32 %v1793_v38, %v1608_v57  ;;  %v1957_v60 = vpop.f32.mrb[6].mxu1 }
0x1711   : > { %1637 = vst [vmem:[%s2519_s7 + $0x70] sm:$0xff] %v1617_v55  ;;  %v1620_v18 = vadd.f32 %v1957_v60, %v1793_v38  ;;  %v1611_v2 = vpop.f32.mrb[7].mxu1 }
0x1712   : > { %1635 = vst [vmem:[%s2519_s7 + $0x60] sm:$0xff] %v1609_v59  ;;  %v1612_v4 = vadd.f32 %v1793_v38, %v1611_v2 }
0x1713   : > { %1638 = vst [vmem:[%s2519_s7 + $0x78] sm:$0xff] %v1620_v18 }
0x1714   : > { %1636 = vst [vmem:[%s2519_s7 + $0x68] sm:$0xff] %v1612_v4 }
0x1715 PF: > { %s19_s27 = sadd.s32 1, %s2122_s27  }
0x1716   : > { %p16_p6 = scmp.ge.s32.totalorder %s19_s27, 4  }
0x1718   :  { %18 = sbr.rel (!%p16_p6) target bundleno = 1 (0x1), region = 117 }

</bundles_post_ra>
